<compile_context>
chip_gen: v7x
topology: tpu7x:2x2x1
jax: 0.10.0
libtpu: 0.0.40
codegen_flags: <defaults>
</compile_context>

<pallas_src>
import math

import jax
import jax.numpy as jnp
from jax.experimental import pallas as pl


# --------------------------------------------------------------------------
# Fused LSTM cell: one lane-dense matmul per direction per timestep.
# --------------------------------------------------------------------------
def _lstm_cell(x_t, h, c, w, b, H):
    z = jnp.concatenate([x_t, h], axis=-1)                         # (B, I+H)
    g = jnp.dot(z, w, preferred_element_type=jnp.float32) + b      # (B, 4H), 4H = 128 lanes
    i_g = jax.nn.sigmoid(g[:, 0 * H:1 * H])
    f_g = jax.nn.sigmoid(g[:, 1 * H:2 * H])
    g_g = jnp.tanh(g[:, 2 * H:3 * H])
    o_g = jax.nn.sigmoid(g[:, 3 * H:4 * H])
    c_new = f_g * c + i_g * g_g
    h_new = o_g * jnp.tanh(c_new)
    return h_new, c_new


# --------------------------------------------------------------------------
# Kernel 1: one bidirectional LSTM layer (layers 0 .. n_layers-2).
# Single invocation (no grid): whole sequence + weights resident in VMEM,
# fully-unrolled time loop, h/c carried as values, h_n written once at the end.
# --------------------------------------------------------------------------
def _make_bilstm_layer_kernel(T, H):
    def kernel(x_ref, wf_ref, bf_ref, wb_ref, bb_ref,
               outf_ref, outb_ref, hnf_ref, hnb_ref):
        B = x_ref.shape[1]
        wf, bf = wf_ref[...], bf_ref[...]          # hoist weight loads out of the loop
        wb, bb = wb_ref[...], bb_ref[...]
        h_f = jnp.zeros((B, H), jnp.float32)
        c_f = jnp.zeros((B, H), jnp.float32)
        h_b = jnp.zeros((B, H), jnp.float32)
        c_b = jnp.zeros((B, H), jnp.float32)
        # T is small & static -> fully unrolled loop with constant indices.
        # TODO(synk): for large T switch to a time-grid / lax.fori_loop to bound code size.
        for t in range(T):
            h_f, c_f = _lstm_cell(x_ref[t], h_f, c_f, wf, bf, H)
            h_b, c_b = _lstm_cell(x_ref[T - 1 - t], h_b, c_b, wb, bb, H)
            outf_ref[t] = h_f
            outb_ref[T - 1 - t] = h_b
        hnf_ref[...] = h_f                          # final-state writes happen exactly once
        hnb_ref[...] = h_b
    return kernel


def run_bilstm_layer(x_seq, wf, bf, wb, bb):
    T, B, _I = x_seq.shape
    H = wf.shape[-1] // 4
    return pl.pallas_call(
        _make_bilstm_layer_kernel(T, H),
        out_shape=(jax.ShapeDtypeStruct((T, B, H), jnp.float32),   # forward hidden per step
                   jax.ShapeDtypeStruct((T, B, H), jnp.float32),   # backward hidden per step
                   jax.ShapeDtypeStruct((B, H), jnp.float32),      # final forward h
                   jax.ShapeDtypeStruct((B, H), jnp.float32)),     # final backward h
    )(x_seq, wf, bf, wb, bb)


# --------------------------------------------------------------------------
# Kernel 2: LAST bidirectional LSTM layer fused with attention + FC + CE loss.
# Takes the previous layers' final hidden states as extra (B, H) inputs; never
# writes the last layer's per-timestep sequence output (it is unused).
# --------------------------------------------------------------------------
def _make_bilstm_attn_fc_loss_kernel(T, H, n_prev):
    def kernel(*refs):
        x_ref, wf_ref, bf_ref, wb_ref, bb_ref = refs[:5]
        hprev_refs = refs[5:5 + n_prev]
        wqkv_ref, wfc_ref, bfc_ref, y1h_ref, logits_ref, loss_ref = refs[5 + n_prev:]

        B = x_ref.shape[1]
        wf, bf = wf_ref[...], bf_ref[...]
        wb, bb = wb_ref[...], bb_ref[...]
        h_f = jnp.zeros((B, H), jnp.float32)
        c_f = jnp.zeros((B, H), jnp.float32)
        h_b = jnp.zeros((B, H), jnp.float32)
        c_b = jnp.zeros((B, H), jnp.float32)
        for t in range(T):
            h_f, c_f = _lstm_cell(x_ref[t], h_f, c_f, wf, bf, H)
            h_b, c_b = _lstm_cell(x_ref[T - 1 - t], h_b, c_b, wb, bb, H)

        # ---- attention over h_n (att_out is invariant to the ordering of the L states) ----
        h_states = [r[...] for r in hprev_refs] + [h_f, h_b]       # L x (B, H)
        L = len(h_states)
        wqkv = wqkv_ref[...]                                       # fused (H, 3H) projection
        Q, K, V = [], [], []
        for h in h_states:
            z = jnp.dot(h, wqkv, preferred_element_type=jnp.float32)   # (B, 3H)
            Q.append(z[:, 0 * H:1 * H])
            K.append(z[:, 1 * H:2 * H])
            V.append(z[:, 2 * H:3 * H])

        scale = 1.0 / math.sqrt(H)
        att_out = jnp.zeros((B, H), jnp.float32)                   # = att_map.sum(1)
        for q in range(L):
            s = [jnp.sum(Q[q] * K[k], axis=-1, keepdims=True) * scale for k in range(L)]
            m = s[0]
            for k in range(1, L):
                m = jnp.maximum(m, s[k])
            e = [jnp.exp(sk - m) for sk in s]
            denom = e[0]
            for k in range(1, L):
                denom = denom + e[k]
            inv = pl.reciprocal(denom, approx=True)                # softmax denom on the EUP
            for k in range(L):
                att_out = att_out + (e[k] * inv) * V[k]

        logits = jnp.dot(att_out, wfc_ref[...],
                         preferred_element_type=jnp.float32) + bfc_ref[...]
        logits_ref[...] = logits

        # CrossEntropyLoss (mean reduction) via one-hot labels
        mx = jnp.max(logits, axis=-1, keepdims=True)
        lse = jnp.log(jnp.sum(jnp.exp(logits - mx), axis=-1, keepdims=True)) + mx
        nll = -jnp.sum(y1h_ref[...] * (logits - lse), axis=-1, keepdims=True)   # (B, 1)
        loss_ref[...] = jnp.sum(nll, axis=0, keepdims=True) * (1.0 / B)
    return kernel


def run_bilstm_attn_fc_loss(x_seq, wf, bf, wb, bb, h_prev, wqkv, wfc, bfc, y1h):
    T, B, _I = x_seq.shape
    H = wf.shape[-1] // 4
    C = wfc.shape[-1]
    return pl.pallas_call(
        _make_bilstm_attn_fc_loss_kernel(T, H, len(h_prev)),
        out_shape=(jax.ShapeDtypeStruct((B, C), jnp.float32),      # logits
                   jax.ShapeDtypeStruct((1, 1), jnp.float32)),     # mean CE loss
    )(x_seq, wf, bf, wb, bb, *h_prev, wqkv, wfc, bfc, y1h)


# --------------------------------------------------------------------------
# Plain-JAX glue reproducing LSTM_Attention.forward
# --------------------------------------------------------------------------
def lstm_attention_forward(params, x_tokens, y_labels, n_layers, num_class):
    # both nn.Embedding.from_pretrained tables share pretrain_weights -> identical lookups
    emb = jnp.take(params['embedding'], x_tokens, axis=0)          # (B, T, E)
    embeddings = jnp.concatenate([emb, emb], axis=2)               # (B, T, 2E)
    # TODO(synk): nn.Dropout treated as eval-mode identity (no RNG masking).

    layer_in = jnp.transpose(embeddings, (1, 0, 2))                # time-major (T, B, 2E)
    h_prev = []                                                    # h_n entries, order layer*2 + dir
    for l in range(n_layers - 1):
        p = params['lstm'][l]
        out_f, out_b, h_f, h_b = run_bilstm_layer(layer_in, p['wf'], p['bf'], p['wb'], p['bb'])
        layer_in = jnp.concatenate([out_f, out_b], axis=-1)        # (T, B, 2H) next-layer input
        h_prev += [h_f, h_b]

    p = params['lstm'][n_layers - 1]
    y1h = jax.nn.one_hot(y_labels, num_class, dtype=jnp.float32)
    logits, loss = run_bilstm_attn_fc_loss(layer_in, p['wf'], p['bf'], p['wb'], p['bb'],
                                           h_prev, params['wqkv'], params['wfc'],
                                           params['bfc'], y1h)
    pred = jnp.argmax(logits, axis=-1)
    return loss[0, 0], pred


# --------------------------------------------------------------------------
# Deterministic synthetic parameters, generated directly in the packed layout.
# --------------------------------------------------------------------------
def init_params(key, vocab, E, H, n_layers, C):
    ks = jax.random.split(key, 6)

    def rnd(k, shape, scale=0.1):
        return (scale * jax.random.normal(k, shape)).astype(jnp.float32)

    params = {'embedding': rnd(ks[0], (vocab, E), 1.0)}
    lstm = []
    kk = jax.random.split(ks[1], n_layers * 4)
    idx = 0
    for l in range(n_layers):
        I = 2 * E if l == 0 else 2 * H
        layer = {}
        for d in ('f', 'b'):                                       # forward / backward direction
            layer['w' + d] = rnd(kk[idx], (I + H, 4 * H))          # [W_ih.T ; W_hh.T], gates i,f,g,o
            layer['b' + d] = rnd(kk[idx + 1], (1, 4 * H))          # b_ih + b_hh
            idx += 2
        lstm.append(layer)
    params['lstm'] = lstm
    params['wqkv'] = rnd(ks[2], (H, 3 * H))                        # [W_Q.T | W_K.T | W_V.T]
    params['wfc'] = rnd(ks[3], (H, C))                             # fc.weight.T
    params['bfc'] = rnd(ks[4], (1, C))                             # fc.bias
    return params


if __name__ == "__main__":
    vocab_size, embedding_dim, hidden_dim = 50, 16, 32
    n_layers, num_class = 2, 3
    B, T = 2, 8

    key = jax.random.PRNGKey(0)
    kp, kx, ky = jax.random.split(key, 3)
    params = init_params(kp, vocab_size, embedding_dim, hidden_dim, n_layers, num_class)
    x = jax.random.randint(kx, (B, T), 0, vocab_size, dtype=jnp.int32)
    y = jax.random.randint(ky, (B,), 0, num_class, dtype=jnp.int32)

    loss, pred = lstm_attention_forward(params, x, y, n_layers, num_class)
    jax.block_until_ready((loss, pred))
    print("KERNEL_OK")
</pallas_src>

<mosaic_0001>
module attributes {stable_mosaic.version = 11 : i64} {
  func.func @kernel(%arg0: memref<8x2x32xf32, #tpu.memory_space<vmem>>, %arg1: memref<64x128xf32, #tpu.memory_space<vmem>>, %arg2: memref<1x128xf32, #tpu.memory_space<vmem>>, %arg3: memref<64x128xf32, #tpu.memory_space<vmem>>, %arg4: memref<1x128xf32, #tpu.memory_space<vmem>>, %arg5: memref<8x2x32xf32, #tpu.memory_space<vmem>>, %arg6: memref<8x2x32xf32, #tpu.memory_space<vmem>>, %arg7: memref<2x32xf32, #tpu.memory_space<vmem>>, %arg8: memref<2x32xf32, #tpu.memory_space<vmem>>) attributes {dimension_semantics = [], scalar_prefetch = 0 : i64, scratch_operands = 0 : i64, tpu.core_type = #tpu.core_type<tc>} {
    %c0 = arith.constant 0 : index
    %c0_0 = arith.constant 0 : index
    %0 = vector.load %arg1[%c0, %c0_0] : memref<64x128xf32, #tpu.memory_space<vmem>>, vector<64x128xf32>
    %c0_1 = arith.constant 0 : index
    %c0_2 = arith.constant 0 : index
    %1 = vector.load %arg2[%c0_1, %c0_2] : memref<1x128xf32, #tpu.memory_space<vmem>>, vector<1x128xf32>
    %c0_3 = arith.constant 0 : index
    %c0_4 = arith.constant 0 : index
    %2 = vector.load %arg3[%c0_3, %c0_4] : memref<64x128xf32, #tpu.memory_space<vmem>>, vector<64x128xf32>
    %c0_5 = arith.constant 0 : index
    %c0_6 = arith.constant 0 : index
    %3 = vector.load %arg4[%c0_5, %c0_6] : memref<1x128xf32, #tpu.memory_space<vmem>>, vector<1x128xf32>
    %cst = arith.constant 0.000000e+00 : f32
    %4 = vector.broadcast %cst : f32 to vector<2x32xf32>
    %cst_7 = arith.constant 0.000000e+00 : f32
    %5 = vector.broadcast %cst_7 : f32 to vector<2x32xf32>
    %cst_8 = arith.constant 0.000000e+00 : f32
    %6 = vector.broadcast %cst_8 : f32 to vector<2x32xf32>
    %cst_9 = arith.constant 0.000000e+00 : f32
    %7 = vector.broadcast %cst_9 : f32 to vector<2x32xf32>
    %c0_10 = arith.constant 0 : index
    %c0_11 = arith.constant 0 : index
    %c0_12 = arith.constant 0 : index
    %8 = vector.load %arg0[%c0_10, %c0_11, %c0_12] : memref<8x2x32xf32, #tpu.memory_space<vmem>>, vector<1x2x32xf32>
    %9 = vector.shape_cast %8 : vector<1x2x32xf32> to vector<2x32xf32>
    %10 = tpu.concatenate %9, %4 in 1 : vector<2x32xf32>, vector<2x32xf32> -> vector<2x64xf32>
    %cst_13 = arith.constant dense<0.000000e+00> : vector<2x128xf32>
    %11 = tpu.matmul %10, %0, %cst_13 {dimension_numbers = #tpu.dot_dimension_numbers<[1], [0], [0], [1], [0, 0, 1, 1], [], []>} : vector<2x64xf32>, vector<64x128xf32>, vector<2x128xf32> -> vector<2x128xf32>
    %12 = vector.broadcast %1 : vector<1x128xf32> to vector<2x128xf32>
    %13 = arith.addf %11, %12 : vector<2x128xf32>
    %14 = vector.extract_strided_slice %13 {offsets = [0, 0], sizes = [2, 32], strides = [1, 1]} : vector<2x128xf32> to vector<2x32xf32>
    %15 = arith.negf %14 : vector<2x32xf32>
    %16 = math.exp %15 : vector<2x32xf32>
    %cst_14 = arith.constant 1.000000e+00 : f32
    %17 = vector.broadcast %cst_14 : f32 to vector<2x32xf32>
    %18 = arith.addf %17, %16 : vector<2x32xf32>
    %19 = arith.divf %17, %18 : vector<2x32xf32>
    %20 = vector.extract_strided_slice %13 {offsets = [0, 32], sizes = [2, 32], strides = [1, 1]} : vector<2x128xf32> to vector<2x32xf32>
    %21 = arith.negf %20 : vector<2x32xf32>
    %22 = math.exp %21 : vector<2x32xf32>
    %cst_15 = arith.constant 1.000000e+00 : f32
    %23 = vector.broadcast %cst_15 : f32 to vector<2x32xf32>
    %24 = arith.addf %23, %22 : vector<2x32xf32>
    %25 = arith.divf %23, %24 : vector<2x32xf32>
    %26 = vector.extract_strided_slice %13 {offsets = [0, 64], sizes = [2, 32], strides = [1, 1]} : vector<2x128xf32> to vector<2x32xf32>
    %27 = math.tanh %26 : vector<2x32xf32>
    %28 = vector.extract_strided_slice %13 {offsets = [0, 96], sizes = [2, 32], strides = [1, 1]} : vector<2x128xf32> to vector<2x32xf32>
    %29 = arith.negf %28 : vector<2x32xf32>
    %30 = math.exp %29 : vector<2x32xf32>
    %cst_16 = arith.constant 1.000000e+00 : f32
    %31 = vector.broadcast %cst_16 : f32 to vector<2x32xf32>
    %32 = arith.addf %31, %30 : vector<2x32xf32>
    %33 = arith.divf %31, %32 : vector<2x32xf32>
    %34 = arith.mulf %25, %5 : vector<2x32xf32>
    %35 = arith.mulf %19, %27 : vector<2x32xf32>
    %36 = arith.addf %34, %35 : vector<2x32xf32>
    %37 = math.tanh %36 : vector<2x32xf32>
    %38 = arith.mulf %33, %37 : vector<2x32xf32>
    %c7 = arith.constant 7 : index
    %c0_17 = arith.constant 0 : index
    %c0_18 = arith.constant 0 : index
    %39 = vector.load %arg0[%c7, %c0_17, %c0_18] : memref<8x2x32xf32, #tpu.memory_space<vmem>>, vector<1x2x32xf32>
    %40 = vector.shape_cast %39 : vector<1x2x32xf32> to vector<2x32xf32>
    %41 = tpu.concatenate %40, %6 in 1 : vector<2x32xf32>, vector<2x32xf32> -> vector<2x64xf32>
    %cst_19 = arith.constant dense<0.000000e+00> : vector<2x128xf32>
    %42 = tpu.matmul %41, %2, %cst_19 {dimension_numbers = #tpu.dot_dimension_numbers<[1], [0], [0], [1], [0, 0, 1, 1], [], []>} : vector<2x64xf32>, vector<64x128xf32>, vector<2x128xf32> -> vector<2x128xf32>
    %43 = vector.broadcast %3 : vector<1x128xf32> to vector<2x128xf32>
    %44 = arith.addf %42, %43 : vector<2x128xf32>
    %45 = vector.extract_strided_slice %44 {offsets = [0, 0], sizes = [2, 32], strides = [1, 1]} : vector<2x128xf32> to vector<2x32xf32>
    %46 = arith.negf %45 : vector<2x32xf32>
    %47 = math.exp %46 : vector<2x32xf32>
    %cst_20 = arith.constant 1.000000e+00 : f32
    %48 = vector.broadcast %cst_20 : f32 to vector<2x32xf32>
    %49 = arith.addf %48, %47 : vector<2x32xf32>
    %50 = arith.divf %48, %49 : vector<2x32xf32>
    %51 = vector.extract_strided_slice %44 {offsets = [0, 32], sizes = [2, 32], strides = [1, 1]} : vector<2x128xf32> to vector<2x32xf32>
    %52 = arith.negf %51 : vector<2x32xf32>
    %53 = math.exp %52 : vector<2x32xf32>
    %cst_21 = arith.constant 1.000000e+00 : f32
    %54 = vector.broadcast %cst_21 : f32 to vector<2x32xf32>
    %55 = arith.addf %54, %53 : vector<2x32xf32>
    %56 = arith.divf %54, %55 : vector<2x32xf32>
    %57 = vector.extract_strided_slice %44 {offsets = [0, 64], sizes = [2, 32], strides = [1, 1]} : vector<2x128xf32> to vector<2x32xf32>
    %58 = math.tanh %57 : vector<2x32xf32>
    %59 = vector.extract_strided_slice %44 {offsets = [0, 96], sizes = [2, 32], strides = [1, 1]} : vector<2x128xf32> to vector<2x32xf32>
    %60 = arith.negf %59 : vector<2x32xf32>
    %61 = math.exp %60 : vector<2x32xf32>
    %cst_22 = arith.constant 1.000000e+00 : f32
    %62 = vector.broadcast %cst_22 : f32 to vector<2x32xf32>
    %63 = arith.addf %62, %61 : vector<2x32xf32>
    %64 = arith.divf %62, %63 : vector<2x32xf32>
    %65 = arith.mulf %56, %7 : vector<2x32xf32>
    %66 = arith.mulf %50, %58 : vector<2x32xf32>
    %67 = arith.addf %65, %66 : vector<2x32xf32>
    %68 = math.tanh %67 : vector<2x32xf32>
    %69 = arith.mulf %64, %68 : vector<2x32xf32>
    %c0_23 = arith.constant 0 : index
    %c0_24 = arith.constant 0 : index
    %c0_25 = arith.constant 0 : index
    %70 = vector.load %arg5[%c0_23, %c0_24, %c0_25] : memref<8x2x32xf32, #tpu.memory_space<vmem>>, vector<1x2x32xf32>
    %71 = vector.shape_cast %70 : vector<1x2x32xf32> to vector<2x32xf32>
    %72 = vector.shape_cast %38 : vector<2x32xf32> to vector<1x2x32xf32>
    tpu.vector_store %arg5[%c0_23, %c0_24, %c0_25], %72 {strides = array<i32>} : memref<8x2x32xf32, #tpu.memory_space<vmem>>, vector<1x2x32xf32>,
    %c7_26 = arith.constant 7 : index
    %c0_27 = arith.constant 0 : index
    %c0_28 = arith.constant 0 : index
    %73 = vector.load %arg6[%c7_26, %c0_27, %c0_28] : memref<8x2x32xf32, #tpu.memory_space<vmem>>, vector<1x2x32xf32>
    %74 = vector.shape_cast %73 : vector<1x2x32xf32> to vector<2x32xf32>
    %75 = vector.shape_cast %69 : vector<2x32xf32> to vector<1x2x32xf32>
    tpu.vector_store %arg6[%c7_26, %c0_27, %c0_28], %75 {strides = array<i32>} : memref<8x2x32xf32, #tpu.memory_space<vmem>>, vector<1x2x32xf32>,
    %c1 = arith.constant 1 : index
    %c0_29 = arith.constant 0 : index
    %c0_30 = arith.constant 0 : index
    %76 = vector.load %arg0[%c1, %c0_29, %c0_30] : memref<8x2x32xf32, #tpu.memory_space<vmem>>, vector<1x2x32xf32>
    %77 = vector.shape_cast %76 : vector<1x2x32xf32> to vector<2x32xf32>
    %78 = tpu.concatenate %77, %38 in 1 : vector<2x32xf32>, vector<2x32xf32> -> vector<2x64xf32>
    %cst_31 = arith.constant dense<0.000000e+00> : vector<2x128xf32>
    %79 = tpu.matmul %78, %0, %cst_31 {dimension_numbers = #tpu.dot_dimension_numbers<[1], [0], [0], [1], [0, 0, 1, 1], [], []>} : vector<2x64xf32>, vector<64x128xf32>, vector<2x128xf32> -> vector<2x128xf32>
    %80 = vector.broadcast %1 : vector<1x128xf32> to vector<2x128xf32>
    %81 = arith.addf %79, %80 : vector<2x128xf32>
    %82 = vector.extract_strided_slice %81 {offsets = [0, 0], sizes = [2, 32], strides = [1, 1]} : vector<2x128xf32> to vector<2x32xf32>
    %83 = arith.negf %82 : vector<2x32xf32>
    %84 = math.exp %83 : vector<2x32xf32>
    %cst_32 = arith.constant 1.000000e+00 : f32
    %85 = vector.broadcast %cst_32 : f32 to vector<2x32xf32>
    %86 = arith.addf %85, %84 : vector<2x32xf32>
    %87 = arith.divf %85, %86 : vector<2x32xf32>
    %88 = vector.extract_strided_slice %81 {offsets = [0, 32], sizes = [2, 32], strides = [1, 1]} : vector<2x128xf32> to vector<2x32xf32>
    %89 = arith.negf %88 : vector<2x32xf32>
    %90 = math.exp %89 : vector<2x32xf32>
    %cst_33 = arith.constant 1.000000e+00 : f32
    %91 = vector.broadcast %cst_33 : f32 to vector<2x32xf32>
    %92 = arith.addf %91, %90 : vector<2x32xf32>
    %93 = arith.divf %91, %92 : vector<2x32xf32>
    %94 = vector.extract_strided_slice %81 {offsets = [0, 64], sizes = [2, 32], strides = [1, 1]} : vector<2x128xf32> to vector<2x32xf32>
    %95 = math.tanh %94 : vector<2x32xf32>
    %96 = vector.extract_strided_slice %81 {offsets = [0, 96], sizes = [2, 32], strides = [1, 1]} : vector<2x128xf32> to vector<2x32xf32>
    %97 = arith.negf %96 : vector<2x32xf32>
    %98 = math.exp %97 : vector<2x32xf32>
    %cst_34 = arith.constant 1.000000e+00 : f32
    %99 = vector.broadcast %cst_34 : f32 to vector<2x32xf32>
    %100 = arith.addf %99, %98 : vector<2x32xf32>
    %101 = arith.divf %99, %100 : vector<2x32xf32>
    %102 = arith.mulf %93, %36 : vector<2x32xf32>
    %103 = arith.mulf %87, %95 : vector<2x32xf32>
    %104 = arith.addf %102, %103 : vector<2x32xf32>
    %105 = math.tanh %104 : vector<2x32xf32>
    %106 = arith.mulf %101, %105 : vector<2x32xf32>
    %c6 = arith.constant 6 : index
    %c0_35 = arith.constant 0 : index
    %c0_36 = arith.constant 0 : index
    %107 = vector.load %arg0[%c6, %c0_35, %c0_36] : memref<8x2x32xf32, #tpu.memory_space<vmem>>, vector<1x2x32xf32>
    %108 = vector.shape_cast %107 : vector<1x2x32xf32> to vector<2x32xf32>
    %109 = tpu.concatenate %108, %69 in 1 : vector<2x32xf32>, vector<2x32xf32> -> vector<2x64xf32>
    %cst_37 = arith.constant dense<0.000000e+00> : vector<2x128xf32>
    %110 = tpu.matmul %109, %2, %cst_37 {dimension_numbers = #tpu.dot_dimension_numbers<[1], [0], [0], [1], [0, 0, 1, 1], [], []>} : vector<2x64xf32>, vector<64x128xf32>, vector<2x128xf32> -> vector<2x128xf32>
    %111 = vector.broadcast %3 : vector<1x128xf32> to vector<2x128xf32>
    %112 = arith.addf %110, %111 : vector<2x128xf32>
    %113 = vector.extract_strided_slice %112 {offsets = [0, 0], sizes = [2, 32], strides = [1, 1]} : vector<2x128xf32> to vector<2x32xf32>
    %114 = arith.negf %113 : vector<2x32xf32>
    %115 = math.exp %114 : vector<2x32xf32>
    %cst_38 = arith.constant 1.000000e+00 : f32
    %116 = vector.broadcast %cst_38 : f32 to vector<2x32xf32>
    %117 = arith.addf %116, %115 : vector<2x32xf32>
    %118 = arith.divf %116, %117 : vector<2x32xf32>
    %119 = vector.extract_strided_slice %112 {offsets = [0, 32], sizes = [2, 32], strides = [1, 1]} : vector<2x128xf32> to vector<2x32xf32>
    %120 = arith.negf %119 : vector<2x32xf32>
    %121 = math.exp %120 : vector<2x32xf32>
    %cst_39 = arith.constant 1.000000e+00 : f32
    %122 = vector.broadcast %cst_39 : f32 to vector<2x32xf32>
    %123 = arith.addf %122, %121 : vector<2x32xf32>
    %124 = arith.divf %122, %123 : vector<2x32xf32>
    %125 = vector.extract_strided_slice %112 {offsets = [0, 64], sizes = [2, 32], strides = [1, 1]} : vector<2x128xf32> to vector<2x32xf32>
    %126 = math.tanh %125 : vector<2x32xf32>
    %127 = vector.extract_strided_slice %112 {offsets = [0, 96], sizes = [2, 32], strides = [1, 1]} : vector<2x128xf32> to vector<2x32xf32>
    %128 = arith.negf %127 : vector<2x32xf32>
    %129 = math.exp %128 : vector<2x32xf32>
    %cst_40 = arith.constant 1.000000e+00 : f32
    %130 = vector.broadcast %cst_40 : f32 to vector<2x32xf32>
    %131 = arith.addf %130, %129 : vector<2x32xf32>
    %132 = arith.divf %130, %131 : vector<2x32xf32>
    %133 = arith.mulf %124, %67 : vector<2x32xf32>
    %134 = arith.mulf %118, %126 : vector<2x32xf32>
    %135 = arith.addf %133, %134 : vector<2x32xf32>
    %136 = math.tanh %135 : vector<2x32xf32>
    %137 = arith.mulf %132, %136 : vector<2x32xf32>
    %c1_41 = arith.constant 1 : index
    %c0_42 = arith.constant 0 : index
    %c0_43 = arith.constant 0 : index
    %138 = vector.load %arg5[%c1_41, %c0_42, %c0_43] : memref<8x2x32xf32, #tpu.memory_space<vmem>>, vector<1x2x32xf32>
    %139 = vector.shape_cast %138 : vector<1x2x32xf32> to vector<2x32xf32>
    %140 = vector.shape_cast %106 : vector<2x32xf32> to vector<1x2x32xf32>
    tpu.vector_store %arg5[%c1_41, %c0_42, %c0_43], %140 {strides = array<i32>} : memref<8x2x32xf32, #tpu.memory_space<vmem>>, vector<1x2x32xf32>,
    %c6_44 = arith.constant 6 : index
    %c0_45 = arith.constant 0 : index
    %c0_46 = arith.constant 0 : index
    %141 = vector.load %arg6[%c6_44, %c0_45, %c0_46] : memref<8x2x32xf32, #tpu.memory_space<vmem>>, vector<1x2x32xf32>
    %142 = vector.shape_cast %141 : vector<1x2x32xf32> to vector<2x32xf32>
    %143 = vector.shape_cast %137 : vector<2x32xf32> to vector<1x2x32xf32>
    tpu.vector_store %arg6[%c6_44, %c0_45, %c0_46], %143 {strides = array<i32>} : memref<8x2x32xf32, #tpu.memory_space<vmem>>, vector<1x2x32xf32>,
    %c2 = arith.constant 2 : index
    %c0_47 = arith.constant 0 : index
    %c0_48 = arith.constant 0 : index
    %144 = vector.load %arg0[%c2, %c0_47, %c0_48] : memref<8x2x32xf32, #tpu.memory_space<vmem>>, vector<1x2x32xf32>
    %145 = vector.shape_cast %144 : vector<1x2x32xf32> to vector<2x32xf32>
    %146 = tpu.concatenate %145, %106 in 1 : vector<2x32xf32>, vector<2x32xf32> -> vector<2x64xf32>
    %cst_49 = arith.constant dense<0.000000e+00> : vector<2x128xf32>
    %147 = tpu.matmul %146, %0, %cst_49 {dimension_numbers = #tpu.dot_dimension_numbers<[1], [0], [0], [1], [0, 0, 1, 1], [], []>} : vector<2x64xf32>, vector<64x128xf32>, vector<2x128xf32> -> vector<2x128xf32>
    %148 = vector.broadcast %1 : vector<1x128xf32> to vector<2x128xf32>
    %149 = arith.addf %147, %148 : vector<2x128xf32>
    %150 = vector.extract_strided_slice %149 {offsets = [0, 0], sizes = [2, 32], strides = [1, 1]} : vector<2x128xf32> to vector<2x32xf32>
    %151 = arith.negf %150 : vector<2x32xf32>
    %152 = math.exp %151 : vector<2x32xf32>
    %cst_50 = arith.constant 1.000000e+00 : f32
    %153 = vector.broadcast %cst_50 : f32 to vector<2x32xf32>
    %154 = arith.addf %153, %152 : vector<2x32xf32>
    %155 = arith.divf %153, %154 : vector<2x32xf32>
    %156 = vector.extract_strided_slice %149 {offsets = [0, 32], sizes = [2, 32], strides = [1, 1]} : vector<2x128xf32> to vector<2x32xf32>
    %157 = arith.negf %156 : vector<2x32xf32>
    %158 = math.exp %157 : vector<2x32xf32>
    %cst_51 = arith.constant 1.000000e+00 : f32
    %159 = vector.broadcast %cst_51 : f32 to vector<2x32xf32>
    %160 = arith.addf %159, %158 : vector<2x32xf32>
    %161 = arith.divf %159, %160 : vector<2x32xf32>
    %162 = vector.extract_strided_slice %149 {offsets = [0, 64], sizes = [2, 32], strides = [1, 1]} : vector<2x128xf32> to vector<2x32xf32>
    %163 = math.tanh %162 : vector<2x32xf32>
    %164 = vector.extract_strided_slice %149 {offsets = [0, 96], sizes = [2, 32], strides = [1, 1]} : vector<2x128xf32> to vector<2x32xf32>
    %165 = arith.negf %164 : vector<2x32xf32>
    %166 = math.exp %165 : vector<2x32xf32>
    %cst_52 = arith.constant 1.000000e+00 : f32
    %167 = vector.broadcast %cst_52 : f32 to vector<2x32xf32>
    %168 = arith.addf %167, %166 : vector<2x32xf32>
    %169 = arith.divf %167, %168 : vector<2x32xf32>
    %170 = arith.mulf %161, %104 : vector<2x32xf32>
    %171 = arith.mulf %155, %163 : vector<2x32xf32>
    %172 = arith.addf %170, %171 : vector<2x32xf32>
    %173 = math.tanh %172 : vector<2x32xf32>
    %174 = arith.mulf %169, %173 : vector<2x32xf32>
    %c5 = arith.constant 5 : index
    %c0_53 = arith.constant 0 : index
    %c0_54 = arith.constant 0 : index
    %175 = vector.load %arg0[%c5, %c0_53, %c0_54] : memref<8x2x32xf32, #tpu.memory_space<vmem>>, vector<1x2x32xf32>
    %176 = vector.shape_cast %175 : vector<1x2x32xf32> to vector<2x32xf32>
    %177 = tpu.concatenate %176, %137 in 1 : vector<2x32xf32>, vector<2x32xf32> -> vector<2x64xf32>
    %cst_55 = arith.constant dense<0.000000e+00> : vector<2x128xf32>
    %178 = tpu.matmul %177, %2, %cst_55 {dimension_numbers = #tpu.dot_dimension_numbers<[1], [0], [0], [1], [0, 0, 1, 1], [], []>} : vector<2x64xf32>, vector<64x128xf32>, vector<2x128xf32> -> vector<2x128xf32>
    %179 = vector.broadcast %3 : vector<1x128xf32> to vector<2x128xf32>
    %180 = arith.addf %178, %179 : vector<2x128xf32>
    %181 = vector.extract_strided_slice %180 {offsets = [0, 0], sizes = [2, 32], strides = [1, 1]} : vector<2x128xf32> to vector<2x32xf32>
    %182 = arith.negf %181 : vector<2x32xf32>
    %183 = math.exp %182 : vector<2x32xf32>
    %cst_56 = arith.constant 1.000000e+00 : f32
    %184 = vector.broadcast %cst_56 : f32 to vector<2x32xf32>
    %185 = arith.addf %184, %183 : vector<2x32xf32>
    %186 = arith.divf %184, %185 : vector<2x32xf32>
    %187 = vector.extract_strided_slice %180 {offsets = [0, 32], sizes = [2, 32], strides = [1, 1]} : vector<2x128xf32> to vector<2x32xf32>
    %188 = arith.negf %187 : vector<2x32xf32>
    %189 = math.exp %188 : vector<2x32xf32>
    %cst_57 = arith.constant 1.000000e+00 : f32
    %190 = vector.broadcast %cst_57 : f32 to vector<2x32xf32>
    %191 = arith.addf %190, %189 : vector<2x32xf32>
    %192 = arith.divf %190, %191 : vector<2x32xf32>
    %193 = vector.extract_strided_slice %180 {offsets = [0, 64], sizes = [2, 32], strides = [1, 1]} : vector<2x128xf32> to vector<2x32xf32>
    %194 = math.tanh %193 : vector<2x32xf32>
    %195 = vector.extract_strided_slice %180 {offsets = [0, 96], sizes = [2, 32], strides = [1, 1]} : vector<2x128xf32> to vector<2x32xf32>
    %196 = arith.negf %195 : vector<2x32xf32>
    %197 = math.exp %196 : vector<2x32xf32>
    %cst_58 = arith.constant 1.000000e+00 : f32
    %198 = vector.broadcast %cst_58 : f32 to vector<2x32xf32>
    %199 = arith.addf %198, %197 : vector<2x32xf32>
    %200 = arith.divf %198, %199 : vector<2x32xf32>
    %201 = arith.mulf %192, %135 : vector<2x32xf32>
    %202 = arith.mulf %186, %194 : vector<2x32xf32>
    %203 = arith.addf %201, %202 : vector<2x32xf32>
    %204 = math.tanh %203 : vector<2x32xf32>
    %205 = arith.mulf %200, %204 : vector<2x32xf32>
    %c2_59 = arith.constant 2 : index
    %c0_60 = arith.constant 0 : index
    %c0_61 = arith.constant 0 : index
    %206 = vector.load %arg5[%c2_59, %c0_60, %c0_61] : memref<8x2x32xf32, #tpu.memory_space<vmem>>, vector<1x2x32xf32>
    %207 = vector.shape_cast %206 : vector<1x2x32xf32> to vector<2x32xf32>
    %208 = vector.shape_cast %174 : vector<2x32xf32> to vector<1x2x32xf32>
    tpu.vector_store %arg5[%c2_59, %c0_60, %c0_61], %208 {strides = array<i32>} : memref<8x2x32xf32, #tpu.memory_space<vmem>>, vector<1x2x32xf32>,
    %c5_62 = arith.constant 5 : index
    %c0_63 = arith.constant 0 : index
    %c0_64 = arith.constant 0 : index
    %209 = vector.load %arg6[%c5_62, %c0_63, %c0_64] : memref<8x2x32xf32, #tpu.memory_space<vmem>>, vector<1x2x32xf32>
    %210 = vector.shape_cast %209 : vector<1x2x32xf32> to vector<2x32xf32>
    %211 = vector.shape_cast %205 : vector<2x32xf32> to vector<1x2x32xf32>
    tpu.vector_store %arg6[%c5_62, %c0_63, %c0_64], %211 {strides = array<i32>} : memref<8x2x32xf32, #tpu.memory_space<vmem>>, vector<1x2x32xf32>,
    %c3 = arith.constant 3 : index
    %c0_65 = arith.constant 0 : index
    %c0_66 = arith.constant 0 : index
    %212 = vector.load %arg0[%c3, %c0_65, %c0_66] : memref<8x2x32xf32, #tpu.memory_space<vmem>>, vector<1x2x32xf32>
    %213 = vector.shape_cast %212 : vector<1x2x32xf32> to vector<2x32xf32>
    %214 = tpu.concatenate %213, %174 in 1 : vector<2x32xf32>, vector<2x32xf32> -> vector<2x64xf32>
    %cst_67 = arith.constant dense<0.000000e+00> : vector<2x128xf32>
    %215 = tpu.matmul %214, %0, %cst_67 {dimension_numbers = #tpu.dot_dimension_numbers<[1], [0], [0], [1], [0, 0, 1, 1], [], []>} : vector<2x64xf32>, vector<64x128xf32>, vector<2x128xf32> -> vector<2x128xf32>
    %216 = vector.broadcast %1 : vector<1x128xf32> to vector<2x128xf32>
    %217 = arith.addf %215, %216 : vector<2x128xf32>
    %218 = vector.extract_strided_slice %217 {offsets = [0, 0], sizes = [2, 32], strides = [1, 1]} : vector<2x128xf32> to vector<2x32xf32>
    %219 = arith.negf %218 : vector<2x32xf32>
    %220 = math.exp %219 : vector<2x32xf32>
    %cst_68 = arith.constant 1.000000e+00 : f32
    %221 = vector.broadcast %cst_68 : f32 to vector<2x32xf32>
    %222 = arith.addf %221, %220 : vector<2x32xf32>
    %223 = arith.divf %221, %222 : vector<2x32xf32>
    %224 = vector.extract_strided_slice %217 {offsets = [0, 32], sizes = [2, 32], strides = [1, 1]} : vector<2x128xf32> to vector<2x32xf32>
    %225 = arith.negf %224 : vector<2x32xf32>
    %226 = math.exp %225 : vector<2x32xf32>
    %cst_69 = arith.constant 1.000000e+00 : f32
    %227 = vector.broadcast %cst_69 : f32 to vector<2x32xf32>
    %228 = arith.addf %227, %226 : vector<2x32xf32>
    %229 = arith.divf %227, %228 : vector<2x32xf32>
    %230 = vector.extract_strided_slice %217 {offsets = [0, 64], sizes = [2, 32], strides = [1, 1]} : vector<2x128xf32> to vector<2x32xf32>
    %231 = math.tanh %230 : vector<2x32xf32>
    %232 = vector.extract_strided_slice %217 {offsets = [0, 96], sizes = [2, 32], strides = [1, 1]} : vector<2x128xf32> to vector<2x32xf32>
    %233 = arith.negf %232 : vector<2x32xf32>
    %234 = math.exp %233 : vector<2x32xf32>
    %cst_70 = arith.constant 1.000000e+00 : f32
    %235 = vector.broadcast %cst_70 : f32 to vector<2x32xf32>
    %236 = arith.addf %235, %234 : vector<2x32xf32>
    %237 = arith.divf %235, %236 : vector<2x32xf32>
    %238 = arith.mulf %229, %172 : vector<2x32xf32>
    %239 = arith.mulf %223, %231 : vector<2x32xf32>
    %240 = arith.addf %238, %239 : vector<2x32xf32>
    %241 = math.tanh %240 : vector<2x32xf32>
    %242 = arith.mulf %237, %241 : vector<2x32xf32>
    %c4 = arith.constant 4 : index
    %c0_71 = arith.constant 0 : index
    %c0_72 = arith.constant 0 : index
    %243 = vector.load %arg0[%c4, %c0_71, %c0_72] : memref<8x2x32xf32, #tpu.memory_space<vmem>>, vector<1x2x32xf32>
    %244 = vector.shape_cast %243 : vector<1x2x32xf32> to vector<2x32xf32>
    %245 = tpu.concatenate %244, %205 in 1 : vector<2x32xf32>, vector<2x32xf32> -> vector<2x64xf32>
    %cst_73 = arith.constant dense<0.000000e+00> : vector<2x128xf32>
    %246 = tpu.matmul %245, %2, %cst_73 {dimension_numbers = #tpu.dot_dimension_numbers<[1], [0], [0], [1], [0, 0, 1, 1], [], []>} : vector<2x64xf32>, vector<64x128xf32>, vector<2x128xf32> -> vector<2x128xf32>
    %247 = vector.broadcast %3 : vector<1x128xf32> to vector<2x128xf32>
    %248 = arith.addf %246, %247 : vector<2x128xf32>
    %249 = vector.extract_strided_slice %248 {offsets = [0, 0], sizes = [2, 32], strides = [1, 1]} : vector<2x128xf32> to vector<2x32xf32>
    %250 = arith.negf %249 : vector<2x32xf32>
    %251 = math.exp %250 : vector<2x32xf32>
    %cst_74 = arith.constant 1.000000e+00 : f32
    %252 = vector.broadcast %cst_74 : f32 to vector<2x32xf32>
    %253 = arith.addf %252, %251 : vector<2x32xf32>
    %254 = arith.divf %252, %253 : vector<2x32xf32>
    %255 = vector.extract_strided_slice %248 {offsets = [0, 32], sizes = [2, 32], strides = [1, 1]} : vector<2x128xf32> to vector<2x32xf32>
    %256 = arith.negf %255 : vector<2x32xf32>
    %257 = math.exp %256 : vector<2x32xf32>
    %cst_75 = arith.constant 1.000000e+00 : f32
    %258 = vector.broadcast %cst_75 : f32 to vector<2x32xf32>
    %259 = arith.addf %258, %257 : vector<2x32xf32>
    %260 = arith.divf %258, %259 : vector<2x32xf32>
    %261 = vector.extract_strided_slice %248 {offsets = [0, 64], sizes = [2, 32], strides = [1, 1]} : vector<2x128xf32> to vector<2x32xf32>
    %262 = math.tanh %261 : vector<2x32xf32>
    %263 = vector.extract_strided_slice %248 {offsets = [0, 96], sizes = [2, 32], strides = [1, 1]} : vector<2x128xf32> to vector<2x32xf32>
    %264 = arith.negf %263 : vector<2x32xf32>
    %265 = math.exp %264 : vector<2x32xf32>
    %cst_76 = arith.constant 1.000000e+00 : f32
    %266 = vector.broadcast %cst_76 : f32 to vector<2x32xf32>
    %267 = arith.addf %266, %265 : vector<2x32xf32>
    %268 = arith.divf %266, %267 : vector<2x32xf32>
    %269 = arith.mulf %260, %203 : vector<2x32xf32>
    %270 = arith.mulf %254, %262 : vector<2x32xf32>
    %271 = arith.addf %269, %270 : vector<2x32xf32>
    %272 = math.tanh %271 : vector<2x32xf32>
    %273 = arith.mulf %268, %272 : vector<2x32xf32>
    %c3_77 = arith.constant 3 : index
    %c0_78 = arith.constant 0 : index
    %c0_79 = arith.constant 0 : index
    %274 = vector.load %arg5[%c3_77, %c0_78, %c0_79] : memref<8x2x32xf32, #tpu.memory_space<vmem>>, vector<1x2x32xf32>
    %275 = vector.shape_cast %274 : vector<1x2x32xf32> to vector<2x32xf32>
    %276 = vector.shape_cast %242 : vector<2x32xf32> to vector<1x2x32xf32>
    tpu.vector_store %arg5[%c3_77, %c0_78, %c0_79], %276 {strides = array<i32>} : memref<8x2x32xf32, #tpu.memory_space<vmem>>, vector<1x2x32xf32>,
    %c4_80 = arith.constant 4 : index
    %c0_81 = arith.constant 0 : index
    %c0_82 = arith.constant 0 : index
    %277 = vector.load %arg6[%c4_80, %c0_81, %c0_82] : memref<8x2x32xf32, #tpu.memory_space<vmem>>, vector<1x2x32xf32>
    %278 = vector.shape_cast %277 : vector<1x2x32xf32> to vector<2x32xf32>
    %279 = vector.shape_cast %273 : vector<2x32xf32> to vector<1x2x32xf32>
    tpu.vector_store %arg6[%c4_80, %c0_81, %c0_82], %279 {strides = array<i32>} : memref<8x2x32xf32, #tpu.memory_space<vmem>>, vector<1x2x32xf32>,
    %c4_83 = arith.constant 4 : index
    %c0_84 = arith.constant 0 : index
    %c0_85 = arith.constant 0 : index
    %280 = vector.load %arg0[%c4_83, %c0_84, %c0_85] : memref<8x2x32xf32, #tpu.memory_space<vmem>>, vector<1x2x32xf32>
    %281 = vector.shape_cast %280 : vector<1x2x32xf32> to vector<2x32xf32>
    %282 = tpu.concatenate %281, %242 in 1 : vector<2x32xf32>, vector<2x32xf32> -> vector<2x64xf32>
    %cst_86 = arith.constant dense<0.000000e+00> : vector<2x128xf32>
    %283 = tpu.matmul %282, %0, %cst_86 {dimension_numbers = #tpu.dot_dimension_numbers<[1], [0], [0], [1], [0, 0, 1, 1], [], []>} : vector<2x64xf32>, vector<64x128xf32>, vector<2x128xf32> -> vector<2x128xf32>
    %284 = vector.broadcast %1 : vector<1x128xf32> to vector<2x128xf32>
    %285 = arith.addf %283, %284 : vector<2x128xf32>
    %286 = vector.extract_strided_slice %285 {offsets = [0, 0], sizes = [2, 32], strides = [1, 1]} : vector<2x128xf32> to vector<2x32xf32>
    %287 = arith.negf %286 : vector<2x32xf32>
    %288 = math.exp %287 : vector<2x32xf32>
    %cst_87 = arith.constant 1.000000e+00 : f32
    %289 = vector.broadcast %cst_87 : f32 to vector<2x32xf32>
    %290 = arith.addf %289, %288 : vector<2x32xf32>
    %291 = arith.divf %289, %290 : vector<2x32xf32>
    %292 = vector.extract_strided_slice %285 {offsets = [0, 32], sizes = [2, 32], strides = [1, 1]} : vector<2x128xf32> to vector<2x32xf32>
    %293 = arith.negf %292 : vector<2x32xf32>
    %294 = math.exp %293 : vector<2x32xf32>
    %cst_88 = arith.constant 1.000000e+00 : f32
    %295 = vector.broadcast %cst_88 : f32 to vector<2x32xf32>
    %296 = arith.addf %295, %294 : vector<2x32xf32>
    %297 = arith.divf %295, %296 : vector<2x32xf32>
    %298 = vector.extract_strided_slice %285 {offsets = [0, 64], sizes = [2, 32], strides = [1, 1]} : vector<2x128xf32> to vector<2x32xf32>
    %299 = math.tanh %298 : vector<2x32xf32>
    %300 = vector.extract_strided_slice %285 {offsets = [0, 96], sizes = [2, 32], strides = [1, 1]} : vector<2x128xf32> to vector<2x32xf32>
    %301 = arith.negf %300 : vector<2x32xf32>
    %302 = math.exp %301 : vector<2x32xf32>
    %cst_89 = arith.constant 1.000000e+00 : f32
    %303 = vector.broadcast %cst_89 : f32 to vector<2x32xf32>
    %304 = arith.addf %303, %302 : vector<2x32xf32>
    %305 = arith.divf %303, %304 : vector<2x32xf32>
    %306 = arith.mulf %297, %240 : vector<2x32xf32>
    %307 = arith.mulf %291, %299 : vector<2x32xf32>
    %308 = arith.addf %306, %307 : vector<2x32xf32>
    %309 = math.tanh %308 : vector<2x32xf32>
    %310 = arith.mulf %305, %309 : vector<2x32xf32>
    %c3_90 = arith.constant 3 : index
    %c0_91 = arith.constant 0 : index
    %c0_92 = arith.constant 0 : index
    %311 = vector.load %arg0[%c3_90, %c0_91, %c0_92] : memref<8x2x32xf32, #tpu.memory_space<vmem>>, vector<1x2x32xf32>
    %312 = vector.shape_cast %311 : vector<1x2x32xf32> to vector<2x32xf32>
    %313 = tpu.concatenate %312, %273 in 1 : vector<2x32xf32>, vector<2x32xf32> -> vector<2x64xf32>
    %cst_93 = arith.constant dense<0.000000e+00> : vector<2x128xf32>
    %314 = tpu.matmul %313, %2, %cst_93 {dimension_numbers = #tpu.dot_dimension_numbers<[1], [0], [0], [1], [0, 0, 1, 1], [], []>} : vector<2x64xf32>, vector<64x128xf32>, vector<2x128xf32> -> vector<2x128xf32>
    %315 = vector.broadcast %3 : vector<1x128xf32> to vector<2x128xf32>
    %316 = arith.addf %314, %315 : vector<2x128xf32>
    %317 = vector.extract_strided_slice %316 {offsets = [0, 0], sizes = [2, 32], strides = [1, 1]} : vector<2x128xf32> to vector<2x32xf32>
    %318 = arith.negf %317 : vector<2x32xf32>
    %319 = math.exp %318 : vector<2x32xf32>
    %cst_94 = arith.constant 1.000000e+00 : f32
    %320 = vector.broadcast %cst_94 : f32 to vector<2x32xf32>
    %321 = arith.addf %320, %319 : vector<2x32xf32>
    %322 = arith.divf %320, %321 : vector<2x32xf32>
    %323 = vector.extract_strided_slice %316 {offsets = [0, 32], sizes = [2, 32], strides = [1, 1]} : vector<2x128xf32> to vector<2x32xf32>
    %324 = arith.negf %323 : vector<2x32xf32>
    %325 = math.exp %324 : vector<2x32xf32>
    %cst_95 = arith.constant 1.000000e+00 : f32
    %326 = vector.broadcast %cst_95 : f32 to vector<2x32xf32>
    %327 = arith.addf %326, %325 : vector<2x32xf32>
    %328 = arith.divf %326, %327 : vector<2x32xf32>
    %329 = vector.extract_strided_slice %316 {offsets = [0, 64], sizes = [2, 32], strides = [1, 1]} : vector<2x128xf32> to vector<2x32xf32>
    %330 = math.tanh %329 : vector<2x32xf32>
    %331 = vector.extract_strided_slice %316 {offsets = [0, 96], sizes = [2, 32], strides = [1, 1]} : vector<2x128xf32> to vector<2x32xf32>
    %332 = arith.negf %331 : vector<2x32xf32>
    %333 = math.exp %332 : vector<2x32xf32>
    %cst_96 = arith.constant 1.000000e+00 : f32
    %334 = vector.broadcast %cst_96 : f32 to vector<2x32xf32>
    %335 = arith.addf %334, %333 : vector<2x32xf32>
    %336 = arith.divf %334, %335 : vector<2x32xf32>
    %337 = arith.mulf %328, %271 : vector<2x32xf32>
    %338 = arith.mulf %322, %330 : vector<2x32xf32>
    %339 = arith.addf %337, %338 : vector<2x32xf32>
    %340 = math.tanh %339 : vector<2x32xf32>
    %341 = arith.mulf %336, %340 : vector<2x32xf32>
    %c4_97 = arith.constant 4 : index
    %c0_98 = arith.constant 0 : index
    %c0_99 = arith.constant 0 : index
    %342 = vector.load %arg5[%c4_97, %c0_98, %c0_99] : memref<8x2x32xf32, #tpu.memory_space<vmem>>, vector<1x2x32xf32>
    %343 = vector.shape_cast %342 : vector<1x2x32xf32> to vector<2x32xf32>
    %344 = vector.shape_cast %310 : vector<2x32xf32> to vector<1x2x32xf32>
    tpu.vector_store %arg5[%c4_97, %c0_98, %c0_99], %344 {strides = array<i32>} : memref<8x2x32xf32, #tpu.memory_space<vmem>>, vector<1x2x32xf32>,
    %c3_100 = arith.constant 3 : index
    %c0_101 = arith.constant 0 : index
    %c0_102 = arith.constant 0 : index
    %345 = vector.load %arg6[%c3_100, %c0_101, %c0_102] : memref<8x2x32xf32, #tpu.memory_space<vmem>>, vector<1x2x32xf32>
    %346 = vector.shape_cast %345 : vector<1x2x32xf32> to vector<2x32xf32>
    %347 = vector.shape_cast %341 : vector<2x32xf32> to vector<1x2x32xf32>
    tpu.vector_store %arg6[%c3_100, %c0_101, %c0_102], %347 {strides = array<i32>} : memref<8x2x32xf32, #tpu.memory_space<vmem>>, vector<1x2x32xf32>,
    %c5_103 = arith.constant 5 : index
    %c0_104 = arith.constant 0 : index
    %c0_105 = arith.constant 0 : index
    %348 = vector.load %arg0[%c5_103, %c0_104, %c0_105] : memref<8x2x32xf32, #tpu.memory_space<vmem>>, vector<1x2x32xf32>
    %349 = vector.shape_cast %348 : vector<1x2x32xf32> to vector<2x32xf32>
    %350 = tpu.concatenate %349, %310 in 1 : vector<2x32xf32>, vector<2x32xf32> -> vector<2x64xf32>
    %cst_106 = arith.constant dense<0.000000e+00> : vector<2x128xf32>
    %351 = tpu.matmul %350, %0, %cst_106 {dimension_numbers = #tpu.dot_dimension_numbers<[1], [0], [0], [1], [0, 0, 1, 1], [], []>} : vector<2x64xf32>, vector<64x128xf32>, vector<2x128xf32> -> vector<2x128xf32>
    %352 = vector.broadcast %1 : vector<1x128xf32> to vector<2x128xf32>
    %353 = arith.addf %351, %352 : vector<2x128xf32>
    %354 = vector.extract_strided_slice %353 {offsets = [0, 0], sizes = [2, 32], strides = [1, 1]} : vector<2x128xf32> to vector<2x32xf32>
    %355 = arith.negf %354 : vector<2x32xf32>
    %356 = math.exp %355 : vector<2x32xf32>
    %cst_107 = arith.constant 1.000000e+00 : f32
    %357 = vector.broadcast %cst_107 : f32 to vector<2x32xf32>
    %358 = arith.addf %357, %356 : vector<2x32xf32>
    %359 = arith.divf %357, %358 : vector<2x32xf32>
    %360 = vector.extract_strided_slice %353 {offsets = [0, 32], sizes = [2, 32], strides = [1, 1]} : vector<2x128xf32> to vector<2x32xf32>
    %361 = arith.negf %360 : vector<2x32xf32>
    %362 = math.exp %361 : vector<2x32xf32>
    %cst_108 = arith.constant 1.000000e+00 : f32
    %363 = vector.broadcast %cst_108 : f32 to vector<2x32xf32>
    %364 = arith.addf %363, %362 : vector<2x32xf32>
    %365 = arith.divf %363, %364 : vector<2x32xf32>
    %366 = vector.extract_strided_slice %353 {offsets = [0, 64], sizes = [2, 32], strides = [1, 1]} : vector<2x128xf32> to vector<2x32xf32>
    %367 = math.tanh %366 : vector<2x32xf32>
    %368 = vector.extract_strided_slice %353 {offsets = [0, 96], sizes = [2, 32], strides = [1, 1]} : vector<2x128xf32> to vector<2x32xf32>
    %369 = arith.negf %368 : vector<2x32xf32>
    %370 = math.exp %369 : vector<2x32xf32>
    %cst_109 = arith.constant 1.000000e+00 : f32
    %371 = vector.broadcast %cst_109 : f32 to vector<2x32xf32>
    %372 = arith.addf %371, %370 : vector<2x32xf32>
    %373 = arith.divf %371, %372 : vector<2x32xf32>
    %374 = arith.mulf %365, %308 : vector<2x32xf32>
    %375 = arith.mulf %359, %367 : vector<2x32xf32>
    %376 = arith.addf %374, %375 : vector<2x32xf32>
    %377 = math.tanh %376 : vector<2x32xf32>
    %378 = arith.mulf %373, %377 : vector<2x32xf32>
    %c2_110 = arith.constant 2 : index
    %c0_111 = arith.constant 0 : index
    %c0_112 = arith.constant 0 : index
    %379 = vector.load %arg0[%c2_110, %c0_111, %c0_112] : memref<8x2x32xf32, #tpu.memory_space<vmem>>, vector<1x2x32xf32>
    %380 = vector.shape_cast %379 : vector<1x2x32xf32> to vector<2x32xf32>
    %381 = tpu.concatenate %380, %341 in 1 : vector<2x32xf32>, vector<2x32xf32> -> vector<2x64xf32>
    %cst_113 = arith.constant dense<0.000000e+00> : vector<2x128xf32>
    %382 = tpu.matmul %381, %2, %cst_113 {dimension_numbers = #tpu.dot_dimension_numbers<[1], [0], [0], [1], [0, 0, 1, 1], [], []>} : vector<2x64xf32>, vector<64x128xf32>, vector<2x128xf32> -> vector<2x128xf32>
    %383 = vector.broadcast %3 : vector<1x128xf32> to vector<2x128xf32>
    %384 = arith.addf %382, %383 : vector<2x128xf32>
    %385 = vector.extract_strided_slice %384 {offsets = [0, 0], sizes = [2, 32], strides = [1, 1]} : vector<2x128xf32> to vector<2x32xf32>
    %386 = arith.negf %385 : vector<2x32xf32>
    %387 = math.exp %386 : vector<2x32xf32>
    %cst_114 = arith.constant 1.000000e+00 : f32
    %388 = vector.broadcast %cst_114 : f32 to vector<2x32xf32>
    %389 = arith.addf %388, %387 : vector<2x32xf32>
    %390 = arith.divf %388, %389 : vector<2x32xf32>
    %391 = vector.extract_strided_slice %384 {offsets = [0, 32], sizes = [2, 32], strides = [1, 1]} : vector<2x128xf32> to vector<2x32xf32>
    %392 = arith.negf %391 : vector<2x32xf32>
    %393 = math.exp %392 : vector<2x32xf32>
    %cst_115 = arith.constant 1.000000e+00 : f32
    %394 = vector.broadcast %cst_115 : f32 to vector<2x32xf32>
    %395 = arith.addf %394, %393 : vector<2x32xf32>
    %396 = arith.divf %394, %395 : vector<2x32xf32>
    %397 = vector.extract_strided_slice %384 {offsets = [0, 64], sizes = [2, 32], strides = [1, 1]} : vector<2x128xf32> to vector<2x32xf32>
    %398 = math.tanh %397 : vector<2x32xf32>
    %399 = vector.extract_strided_slice %384 {offsets = [0, 96], sizes = [2, 32], strides = [1, 1]} : vector<2x128xf32> to vector<2x32xf32>
    %400 = arith.negf %399 : vector<2x32xf32>
    %401 = math.exp %400 : vector<2x32xf32>
    %cst_116 = arith.constant 1.000000e+00 : f32
    %402 = vector.broadcast %cst_116 : f32 to vector<2x32xf32>
    %403 = arith.addf %402, %401 : vector<2x32xf32>
    %404 = arith.divf %402, %403 : vector<2x32xf32>
    %405 = arith.mulf %396, %339 : vector<2x32xf32>
    %406 = arith.mulf %390, %398 : vector<2x32xf32>
    %407 = arith.addf %405, %406 : vector<2x32xf32>
    %408 = math.tanh %407 : vector<2x32xf32>
    %409 = arith.mulf %404, %408 : vector<2x32xf32>
    %c5_117 = arith.constant 5 : index
    %c0_118 = arith.constant 0 : index
    %c0_119 = arith.constant 0 : index
    %410 = vector.load %arg5[%c5_117, %c0_118, %c0_119] : memref<8x2x32xf32, #tpu.memory_space<vmem>>, vector<1x2x32xf32>
    %411 = vector.shape_cast %410 : vector<1x2x32xf32> to vector<2x32xf32>
    %412 = vector.shape_cast %378 : vector<2x32xf32> to vector<1x2x32xf32>
    tpu.vector_store %arg5[%c5_117, %c0_118, %c0_119], %412 {strides = array<i32>} : memref<8x2x32xf32, #tpu.memory_space<vmem>>, vector<1x2x32xf32>,
    %c2_120 = arith.constant 2 : index
    %c0_121 = arith.constant 0 : index
    %c0_122 = arith.constant 0 : index
    %413 = vector.load %arg6[%c2_120, %c0_121, %c0_122] : memref<8x2x32xf32, #tpu.memory_space<vmem>>, vector<1x2x32xf32>
    %414 = vector.shape_cast %413 : vector<1x2x32xf32> to vector<2x32xf32>
    %415 = vector.shape_cast %409 : vector<2x32xf32> to vector<1x2x32xf32>
    tpu.vector_store %arg6[%c2_120, %c0_121, %c0_122], %415 {strides = array<i32>} : memref<8x2x32xf32, #tpu.memory_space<vmem>>, vector<1x2x32xf32>,
    %c6_123 = arith.constant 6 : index
    %c0_124 = arith.constant 0 : index
    %c0_125 = arith.constant 0 : index
    %416 = vector.load %arg0[%c6_123, %c0_124, %c0_125] : memref<8x2x32xf32, #tpu.memory_space<vmem>>, vector<1x2x32xf32>
    %417 = vector.shape_cast %416 : vector<1x2x32xf32> to vector<2x32xf32>
    %418 = tpu.concatenate %417, %378 in 1 : vector<2x32xf32>, vector<2x32xf32> -> vector<2x64xf32>
    %cst_126 = arith.constant dense<0.000000e+00> : vector<2x128xf32>
    %419 = tpu.matmul %418, %0, %cst_126 {dimension_numbers = #tpu.dot_dimension_numbers<[1], [0], [0], [1], [0, 0, 1, 1], [], []>} : vector<2x64xf32>, vector<64x128xf32>, vector<2x128xf32> -> vector<2x128xf32>
    %420 = vector.broadcast %1 : vector<1x128xf32> to vector<2x128xf32>
    %421 = arith.addf %419, %420 : vector<2x128xf32>
    %422 = vector.extract_strided_slice %421 {offsets = [0, 0], sizes = [2, 32], strides = [1, 1]} : vector<2x128xf32> to vector<2x32xf32>
    %423 = arith.negf %422 : vector<2x32xf32>
    %424 = math.exp %423 : vector<2x32xf32>
    %cst_127 = arith.constant 1.000000e+00 : f32
    %425 = vector.broadcast %cst_127 : f32 to vector<2x32xf32>
    %426 = arith.addf %425, %424 : vector<2x32xf32>
    %427 = arith.divf %425, %426 : vector<2x32xf32>
    %428 = vector.extract_strided_slice %421 {offsets = [0, 32], sizes = [2, 32], strides = [1, 1]} : vector<2x128xf32> to vector<2x32xf32>
    %429 = arith.negf %428 : vector<2x32xf32>
    %430 = math.exp %429 : vector<2x32xf32>
    %cst_128 = arith.constant 1.000000e+00 : f32
    %431 = vector.broadcast %cst_128 : f32 to vector<2x32xf32>
    %432 = arith.addf %431, %430 : vector<2x32xf32>
    %433 = arith.divf %431, %432 : vector<2x32xf32>
    %434 = vector.extract_strided_slice %421 {offsets = [0, 64], sizes = [2, 32], strides = [1, 1]} : vector<2x128xf32> to vector<2x32xf32>
    %435 = math.tanh %434 : vector<2x32xf32>
    %436 = vector.extract_strided_slice %421 {offsets = [0, 96], sizes = [2, 32], strides = [1, 1]} : vector<2x128xf32> to vector<2x32xf32>
    %437 = arith.negf %436 : vector<2x32xf32>
    %438 = math.exp %437 : vector<2x32xf32>
    %cst_129 = arith.constant 1.000000e+00 : f32
    %439 = vector.broadcast %cst_129 : f32 to vector<2x32xf32>
    %440 = arith.addf %439, %438 : vector<2x32xf32>
    %441 = arith.divf %439, %440 : vector<2x32xf32>
    %442 = arith.mulf %433, %376 : vector<2x32xf32>
    %443 = arith.mulf %427, %435 : vector<2x32xf32>
    %444 = arith.addf %442, %443 : vector<2x32xf32>
    %445 = math.tanh %444 : vector<2x32xf32>
    %446 = arith.mulf %441, %445 : vector<2x32xf32>
    %c1_130 = arith.constant 1 : index
    %c0_131 = arith.constant 0 : index
    %c0_132 = arith.constant 0 : index
    %447 = vector.load %arg0[%c1_130, %c0_131, %c0_132] : memref<8x2x32xf32, #tpu.memory_space<vmem>>, vector<1x2x32xf32>
    %448 = vector.shape_cast %447 : vector<1x2x32xf32> to vector<2x32xf32>
    %449 = tpu.concatenate %448, %409 in 1 : vector<2x32xf32>, vector<2x32xf32> -> vector<2x64xf32>
    %cst_133 = arith.constant dense<0.000000e+00> : vector<2x128xf32>
    %450 = tpu.matmul %449, %2, %cst_133 {dimension_numbers = #tpu.dot_dimension_numbers<[1], [0], [0], [1], [0, 0, 1, 1], [], []>} : vector<2x64xf32>, vector<64x128xf32>, vector<2x128xf32> -> vector<2x128xf32>
    %451 = vector.broadcast %3 : vector<1x128xf32> to vector<2x128xf32>
    %452 = arith.addf %450, %451 : vector<2x128xf32>
    %453 = vector.extract_strided_slice %452 {offsets = [0, 0], sizes = [2, 32], strides = [1, 1]} : vector<2x128xf32> to vector<2x32xf32>
    %454 = arith.negf %453 : vector<2x32xf32>
    %455 = math.exp %454 : vector<2x32xf32>
    %cst_134 = arith.constant 1.000000e+00 : f32
    %456 = vector.broadcast %cst_134 : f32 to vector<2x32xf32>
    %457 = arith.addf %456, %455 : vector<2x32xf32>
    %458 = arith.divf %456, %457 : vector<2x32xf32>
    %459 = vector.extract_strided_slice %452 {offsets = [0, 32], sizes = [2, 32], strides = [1, 1]} : vector<2x128xf32> to vector<2x32xf32>
    %460 = arith.negf %459 : vector<2x32xf32>
    %461 = math.exp %460 : vector<2x32xf32>
    %cst_135 = arith.constant 1.000000e+00 : f32
    %462 = vector.broadcast %cst_135 : f32 to vector<2x32xf32>
    %463 = arith.addf %462, %461 : vector<2x32xf32>
    %464 = arith.divf %462, %463 : vector<2x32xf32>
    %465 = vector.extract_strided_slice %452 {offsets = [0, 64], sizes = [2, 32], strides = [1, 1]} : vector<2x128xf32> to vector<2x32xf32>
    %466 = math.tanh %465 : vector<2x32xf32>
    %467 = vector.extract_strided_slice %452 {offsets = [0, 96], sizes = [2, 32], strides = [1, 1]} : vector<2x128xf32> to vector<2x32xf32>
    %468 = arith.negf %467 : vector<2x32xf32>
    %469 = math.exp %468 : vector<2x32xf32>
    %cst_136 = arith.constant 1.000000e+00 : f32
    %470 = vector.broadcast %cst_136 : f32 to vector<2x32xf32>
    %471 = arith.addf %470, %469 : vector<2x32xf32>
    %472 = arith.divf %470, %471 : vector<2x32xf32>
    %473 = arith.mulf %464, %407 : vector<2x32xf32>
    %474 = arith.mulf %458, %466 : vector<2x32xf32>
    %475 = arith.addf %473, %474 : vector<2x32xf32>
    %476 = math.tanh %475 : vector<2x32xf32>
    %477 = arith.mulf %472, %476 : vector<2x32xf32>
    %c6_137 = arith.constant 6 : index
    %c0_138 = arith.constant 0 : index
    %c0_139 = arith.constant 0 : index
    %478 = vector.load %arg5[%c6_137, %c0_138, %c0_139] : memref<8x2x32xf32, #tpu.memory_space<vmem>>, vector<1x2x32xf32>
    %479 = vector.shape_cast %478 : vector<1x2x32xf32> to vector<2x32xf32>
    %480 = vector.shape_cast %446 : vector<2x32xf32> to vector<1x2x32xf32>
    tpu.vector_store %arg5[%c6_137, %c0_138, %c0_139], %480 {strides = array<i32>} : memref<8x2x32xf32, #tpu.memory_space<vmem>>, vector<1x2x32xf32>,
    %c1_140 = arith.constant 1 : index
    %c0_141 = arith.constant 0 : index
    %c0_142 = arith.constant 0 : index
    %481 = vector.load %arg6[%c1_140, %c0_141, %c0_142] : memref<8x2x32xf32, #tpu.memory_space<vmem>>, vector<1x2x32xf32>
    %482 = vector.shape_cast %481 : vector<1x2x32xf32> to vector<2x32xf32>
    %483 = vector.shape_cast %477 : vector<2x32xf32> to vector<1x2x32xf32>
    tpu.vector_store %arg6[%c1_140, %c0_141, %c0_142], %483 {strides = array<i32>} : memref<8x2x32xf32, #tpu.memory_space<vmem>>, vector<1x2x32xf32>,
    %c7_143 = arith.constant 7 : index
    %c0_144 = arith.constant 0 : index
    %c0_145 = arith.constant 0 : index
    %484 = vector.load %arg0[%c7_143, %c0_144, %c0_145] : memref<8x2x32xf32, #tpu.memory_space<vmem>>, vector<1x2x32xf32>
    %485 = vector.shape_cast %484 : vector<1x2x32xf32> to vector<2x32xf32>
    %486 = tpu.concatenate %485, %446 in 1 : vector<2x32xf32>, vector<2x32xf32> -> vector<2x64xf32>
    %cst_146 = arith.constant dense<0.000000e+00> : vector<2x128xf32>
    %487 = tpu.matmul %486, %0, %cst_146 {dimension_numbers = #tpu.dot_dimension_numbers<[1], [0], [0], [1], [0, 0, 1, 1], [], []>} : vector<2x64xf32>, vector<64x128xf32>, vector<2x128xf32> -> vector<2x128xf32>
    %488 = vector.broadcast %1 : vector<1x128xf32> to vector<2x128xf32>
    %489 = arith.addf %487, %488 : vector<2x128xf32>
    %490 = vector.extract_strided_slice %489 {offsets = [0, 0], sizes = [2, 32], strides = [1, 1]} : vector<2x128xf32> to vector<2x32xf32>
    %491 = arith.negf %490 : vector<2x32xf32>
    %492 = math.exp %491 : vector<2x32xf32>
    %cst_147 = arith.constant 1.000000e+00 : f32
    %493 = vector.broadcast %cst_147 : f32 to vector<2x32xf32>
    %494 = arith.addf %493, %492 : vector<2x32xf32>
    %495 = arith.divf %493, %494 : vector<2x32xf32>
    %496 = vector.extract_strided_slice %489 {offsets = [0, 32], sizes = [2, 32], strides = [1, 1]} : vector<2x128xf32> to vector<2x32xf32>
    %497 = arith.negf %496 : vector<2x32xf32>
    %498 = math.exp %497 : vector<2x32xf32>
    %cst_148 = arith.constant 1.000000e+00 : f32
    %499 = vector.broadcast %cst_148 : f32 to vector<2x32xf32>
    %500 = arith.addf %499, %498 : vector<2x32xf32>
    %501 = arith.divf %499, %500 : vector<2x32xf32>
    %502 = vector.extract_strided_slice %489 {offsets = [0, 64], sizes = [2, 32], strides = [1, 1]} : vector<2x128xf32> to vector<2x32xf32>
    %503 = math.tanh %502 : vector<2x32xf32>
    %504 = vector.extract_strided_slice %489 {offsets = [0, 96], sizes = [2, 32], strides = [1, 1]} : vector<2x128xf32> to vector<2x32xf32>
    %505 = arith.negf %504 : vector<2x32xf32>
    %506 = math.exp %505 : vector<2x32xf32>
    %cst_149 = arith.constant 1.000000e+00 : f32
    %507 = vector.broadcast %cst_149 : f32 to vector<2x32xf32>
    %508 = arith.addf %507, %506 : vector<2x32xf32>
    %509 = arith.divf %507, %508 : vector<2x32xf32>
    %510 = arith.mulf %501, %444 : vector<2x32xf32>
    %511 = arith.mulf %495, %503 : vector<2x32xf32>
    %512 = arith.addf %510, %511 : vector<2x32xf32>
    %513 = math.tanh %512 : vector<2x32xf32>
    %514 = arith.mulf %509, %513 : vector<2x32xf32>
    %c0_150 = arith.constant 0 : index
    %c0_151 = arith.constant 0 : index
    %c0_152 = arith.constant 0 : index
    %515 = vector.load %arg0[%c0_150, %c0_151, %c0_152] : memref<8x2x32xf32, #tpu.memory_space<vmem>>, vector<1x2x32xf32>
    %516 = vector.shape_cast %515 : vector<1x2x32xf32> to vector<2x32xf32>
    %517 = tpu.concatenate %516, %477 in 1 : vector<2x32xf32>, vector<2x32xf32> -> vector<2x64xf32>
    %cst_153 = arith.constant dense<0.000000e+00> : vector<2x128xf32>
    %518 = tpu.matmul %517, %2, %cst_153 {dimension_numbers = #tpu.dot_dimension_numbers<[1], [0], [0], [1], [0, 0, 1, 1], [], []>} : vector<2x64xf32>, vector<64x128xf32>, vector<2x128xf32> -> vector<2x128xf32>
    %519 = vector.broadcast %3 : vector<1x128xf32> to vector<2x128xf32>
    %520 = arith.addf %518, %519 : vector<2x128xf32>
    %521 = vector.extract_strided_slice %520 {offsets = [0, 0], sizes = [2, 32], strides = [1, 1]} : vector<2x128xf32> to vector<2x32xf32>
    %522 = arith.negf %521 : vector<2x32xf32>
    %523 = math.exp %522 : vector<2x32xf32>
    %cst_154 = arith.constant 1.000000e+00 : f32
    %524 = vector.broadcast %cst_154 : f32 to vector<2x32xf32>
    %525 = arith.addf %524, %523 : vector<2x32xf32>
    %526 = arith.divf %524, %525 : vector<2x32xf32>
    %527 = vector.extract_strided_slice %520 {offsets = [0, 32], sizes = [2, 32], strides = [1, 1]} : vector<2x128xf32> to vector<2x32xf32>
    %528 = arith.negf %527 : vector<2x32xf32>
    %529 = math.exp %528 : vector<2x32xf32>
    %cst_155 = arith.constant 1.000000e+00 : f32
    %530 = vector.broadcast %cst_155 : f32 to vector<2x32xf32>
    %531 = arith.addf %530, %529 : vector<2x32xf32>
    %532 = arith.divf %530, %531 : vector<2x32xf32>
    %533 = vector.extract_strided_slice %520 {offsets = [0, 64], sizes = [2, 32], strides = [1, 1]} : vector<2x128xf32> to vector<2x32xf32>
    %534 = math.tanh %533 : vector<2x32xf32>
    %535 = vector.extract_strided_slice %520 {offsets = [0, 96], sizes = [2, 32], strides = [1, 1]} : vector<2x128xf32> to vector<2x32xf32>
    %536 = arith.negf %535 : vector<2x32xf32>
    %537 = math.exp %536 : vector<2x32xf32>
    %cst_156 = arith.constant 1.000000e+00 : f32
    %538 = vector.broadcast %cst_156 : f32 to vector<2x32xf32>
    %539 = arith.addf %538, %537 : vector<2x32xf32>
    %540 = arith.divf %538, %539 : vector<2x32xf32>
    %541 = arith.mulf %532, %475 : vector<2x32xf32>
    %542 = arith.mulf %526, %534 : vector<2x32xf32>
    %543 = arith.addf %541, %542 : vector<2x32xf32>
    %544 = math.tanh %543 : vector<2x32xf32>
    %545 = arith.mulf %540, %544 : vector<2x32xf32>
    %c7_157 = arith.constant 7 : index
    %c0_158 = arith.constant 0 : index
    %c0_159 = arith.constant 0 : index
    %546 = vector.load %arg5[%c7_157, %c0_158, %c0_159] : memref<8x2x32xf32, #tpu.memory_space<vmem>>, vector<1x2x32xf32>
    %547 = vector.shape_cast %546 : vector<1x2x32xf32> to vector<2x32xf32>
    %548 = vector.shape_cast %514 : vector<2x32xf32> to vector<1x2x32xf32>
    tpu.vector_store %arg5[%c7_157, %c0_158, %c0_159], %548 {strides = array<i32>} : memref<8x2x32xf32, #tpu.memory_space<vmem>>, vector<1x2x32xf32>,
    %c0_160 = arith.constant 0 : index
    %c0_161 = arith.constant 0 : index
    %c0_162 = arith.constant 0 : index
    %549 = vector.load %arg6[%c0_160, %c0_161, %c0_162] : memref<8x2x32xf32, #tpu.memory_space<vmem>>, vector<1x2x32xf32>
    %550 = vector.shape_cast %549 : vector<1x2x32xf32> to vector<2x32xf32>
    %551 = vector.shape_cast %545 : vector<2x32xf32> to vector<1x2x32xf32>
    tpu.vector_store %arg6[%c0_160, %c0_161, %c0_162], %551 {strides = array<i32>} : memref<8x2x32xf32, #tpu.memory_space<vmem>>, vector<1x2x32xf32>,
    %c0_163 = arith.constant 0 : index
    %c0_164 = arith.constant 0 : index
    %552 = vector.load %arg7[%c0_163, %c0_164] : memref<2x32xf32, #tpu.memory_space<vmem>>, vector<2x32xf32>
    tpu.vector_store %arg7[%c0_163, %c0_164], %514 {strides = array<i32>} : memref<2x32xf32, #tpu.memory_space<vmem>>, vector<2x32xf32>,
    %c0_165 = arith.constant 0 : index
    %c0_166 = arith.constant 0 : index
    %553 = vector.load %arg8[%c0_165, %c0_166] : memref<2x32xf32, #tpu.memory_space<vmem>>, vector<2x32xf32>
    tpu.vector_store %arg8[%c0_165, %c0_166], %545 {strides = array<i32>} : memref<2x32xf32, #tpu.memory_space<vmem>>, vector<2x32xf32>,
    return
  }
}

</mosaic_0001>

<bundles_post_ra>
// kernel: tpu_custom_call.1
= control target key start
LH: loop header
LB: loop body
LE: loop exit
PB: predicated region body
PF: predicated region fallthrough
CT: control target
= control target key end

     0   :  { %14 = vsyncpa [#allocation3], 0  ;;  %s3475_s0 = inlined_call_operand.hbm [shape: f32[8,2,32], index: 0, kind: input, shape index: {}]   ;;  %s3476_s1 = inlined_call_operand.hbm [shape: f32[64,128], index: 1, kind: input, shape index: {}]   ;;  %s3477_s2 = inlined_call_operand.vmem [shape: f32[1,128], index: 2, kind: input, shape index: {}]   ;;  %s3478_s3 = inlined_call_operand.hbm [shape: f32[64,128], index: 3, kind: input, shape index: {}]   ;;  %s3479_s4 = inlined_call_operand.vmem [shape: f32[1,128], index: 4, kind: input, shape index: {}]   ;;  %s3480_s5 = inlined_call_operand.hbm [shape: f32[8,2,32], index: 5, kind: output, shape index: {0}]   ;;  %s3481_s6 = inlined_call_operand.hbm [shape: f32[8,2,32], index: 6, kind: output, shape index: {1}]   ;;  %s3482_s7 = inlined_call_operand.hbm [shape: f32[2,32], index: 7, kind: output, shape index: {2}]   ;;  %s3483_s8 = inlined_call_operand.hbm [shape: f32[2,32], index: 8, kind: output, shape index: {3}]  }
   0x1   :  { %15 = vsyncpa [#allocation6], 0 }
   0x2   :  { %16 = vsyncpa [#allocation4], 0 }
   0x3   :  { %17 = vsyncpa [#allocation10], 0 }
   0x4   :  { %18 = vsyncpa [#allocation13], 0  ;;  %s2872_s27 = smov [#allocation5]   ;;  %s2708_s9 = scalar_lea.hbm %s3476_s1, 1024 }
   0x5   :  { %s36_s28 = sshll.u32 %s2872_s27, 4  ;;  %p2709_p0 = scmp.ne.s32.totalorder %s3476_s1, %s2708_s9  ;;  %s37_s28 = int_to_ptr.vmem [resolvable:$true] %s36_s28 }
   0x6   :  { %p2712_p1 = scmp.lt.u32.totalorder %s2708_s9, %s3476_s1 }
   0x8   :  { %p2714_p2 = pnand %p2712_p1, %p2709_p0 }
   0xa   :  { %2717 = shalt.err (!%p2714_p2)
}
   0xb   :  { %s2718_s14 = scalar_lea.vmem %s37_s28, 1024  ;;  %p2723_p4 = scmp.lt.s32.totalorder %s37_s28, %s37_s28 }
   0xc   :  { %p2719_p3 = scmp.ne.s32.totalorder %s37_s28, %s2718_s14  ;;  %p2724_p5 = scmp.lt.s32.totalorder %s2718_s14, %s2718_s14 }
   0xe   :  { %p2725_p6 = por %p2724_p5, %p2723_p4 }
  0x10   :  { %p2726_p7 = pnand %p2725_p6, %p2719_p3 }
  0x12   :  { %2729 = shalt.err (!%p2726_p7)
}
  0x13   :  { %s2873_s15 = smov 128   ;;  %s2874_s16 = smov 8  }
  0x14   :  { %42 = dma.hbm_to_vmem [thread:$0]  %s3476_s1, 1024, %s37_s28, [#allocation6], %s2873_s15, %s2873_s15, %s2874_s16  }
  0x15   :  { %s2875_s19 = smov [#allocation2]   ;;  %s2730_s23 = scalar_lea.hbm %s3475_s0, 256 }
  0x16   :  { %s24_s20 = sshll.u32 %s2875_s19, 4  ;;  %p2731_p8 = scmp.ne.s32.totalorder %s3475_s0, %s2730_s23  ;;  %s25_s20 = int_to_ptr.vmem [resolvable:$true] %s24_s20 }
  0x17   :  { %p2734_p9 = scmp.lt.u32.totalorder %s2730_s23, %s3475_s0 }
  0x19   :  { %p2736_p10 = pnand %p2734_p9, %p2731_p8 }
  0x1b   :  { %2739 = shalt.err (!%p2736_p10)
}
  0x1c   :  { %s2740_s29 = scalar_lea.vmem %s25_s20, 256  ;;  %p2745_p12 = scmp.lt.s32.totalorder %s25_s20, %s25_s20 }
  0x1d   :  { %p2741_p11 = scmp.ne.s32.totalorder %s25_s20, %s2740_s29  ;;  %p2746_p13 = scmp.lt.s32.totalorder %s2740_s29, %s2740_s29 }
  0x1f   :  { %p2747_p0 = por %p2746_p13, %p2745_p12 }
  0x21   :  { %p2748_p1 = pnand %p2747_p0, %p2741_p11 }
  0x23   :  { %2751 = shalt.err (!%p2748_p1)
}
  0x24   :  { %s2876_s1 = smov 32   ;;  %s2877_s28 = smov 2  }
  0x25   :  { %30 = dma.hbm_to_vmem [thread:$0]  %s3475_s0, 256, %s25_s20, [#allocation3], %s2876_s1, %s2876_s1, %s2877_s28  }
  0x26   :  { %s2878_s10 = smov [#allocation7]   ;;  %s2752_s14 = scalar_lea.hbm %s3478_s3, 1024 }
  0x27   :  { %s50_s11 = sshll.u32 %s2878_s10, 4  ;;  %p2753_p2 = scmp.ne.s32.totalorder %s3478_s3, %s2752_s14  ;;  %s51_s11 = int_to_ptr.vmem [resolvable:$true] %s50_s11 }
  0x28   :  { %p2756_p3 = scmp.lt.u32.totalorder %s2752_s14, %s3478_s3 }
  0x2a   :  { %p2758_p4 = pnand %p2756_p3, %p2753_p2 }
  0x2c   :  { %2761 = shalt.err (!%p2758_p4)
}
  0x2d   :  { %s2762_s22 = scalar_lea.vmem %s51_s11, 1024  ;;  %p2767_p6 = scmp.lt.s32.totalorder %s51_s11, %s51_s11 }
  0x2e   :  { %p2763_p5 = scmp.ne.s32.totalorder %s51_s11, %s2762_s22  ;;  %p2768_p7 = scmp.lt.s32.totalorder %s2762_s22, %s2762_s22 }
  0x30   :  { %p2769_p8 = por %p2768_p7, %p2767_p6 }
  0x32   :  { %p2770_p9 = pnand %p2769_p8, %p2763_p5 }
  0x34   :  { %2773 = shalt.err (!%p2770_p9)
}
  0x35   :  { %56 = dma.hbm_to_vmem [thread:$0]  %s3478_s3, 1024, %s51_s11, [#allocation6], %s2873_s15, %s2873_s15, %s2874_s16  }
  0x36   :  { %2862 = dma.done.wait [#allocation3], 256  }
  0x37   :  { %2863 = vsyncadd [#allocation3], 4294967040 }
  0x38   :  { %2864 = dma.done.wait [#allocation6], 2048  }
  0x39   :  { %2865 = vsyncadd [#allocation6], 4294965248  ;;  %v2879_v0 = vmov 0.0|0.0   ;;  %vm2880_vm0 = vmmov 0   ;;  %v2881_v1 = vmov 0.0   ;;  %v77_v2 = vld [vmem:[#allocation7] sm:$0xff] }
  0x3a   :  { %2385 = vmatprep.subr.bf16.mxu1 %v2879_v0  ;;  %2373 = vmatprep.subr.bf16.mxu0 %v2879_v0  ;;  %v78_v3 = vld [vmem:[#allocation7 + $0x8] sm:$0xff]  ;;  %v68_v4 = vld [vmem:[#allocation5] sm:$0xff]  ;;  %v79_v7 = vld [vmem:[#allocation7 + $0x10] sm:$0xff]  ;;  %vm87_vm1 = vcmask 261120   ;;  %vm95_vm2 = vcmask 523264   ;;  %s2882_s24 = smov 64  }
  0x3b   :  { %2104 = vmatprep.mubr.msk.f32.mxu1 %vm2880_vm0, %v2881_v1  ;;  %2085 = vmatprep.mubr.msk.f32.mxu0 %vm2880_vm0, %v2881_v1  ;;  %v2983_v5 = vpack.c.bf16 %v78_v3, %v77_v2  ;;  %v69_v6 = vld [vmem:[#allocation5 + $0x8] sm:$0xff]  ;;  %v80_v8 = vld [vmem:[#allocation7 + $0x18] sm:$0xff]  ;;  %v70_v10 = vld [vmem:[#allocation5 + $0x10] sm:$0xff]  ;;  %vm303_vm3 = vcmask 254976   ;;  %s2884_s25 = smov [#allocation12]   ;;  %s2885_s27 = smov [#allocation8]  }
  0x3c   :  { %v2985_v9 = vpack.c.bf16 %v69_v6, %v68_v4  ;;  %v71_v11 = vld [vmem:[#allocation5 + $0x18] sm:$0xff]  ;;  %v2988_v12 = vpack.c.bf16 %v80_v8, %v79_v7  ;;  %v81_v14 = vld [vmem:[#allocation7 + $0x20] sm:$0xff]  ;;  %v82_v15 = vld [vmem:[#allocation7 + $0x28] sm:$0xff]  ;;  %s1870_s26 = sshll.u32 %s2884_s25, 4  ;;  %s1835_s29 = sshll.u32 %s2885_s27, 4  ;;  %s3403_s26 = int_to_ptr.vmem [resolvable:$true] %s1870_s26  ;;  %s3407_s29 = int_to_ptr.vmem [resolvable:$true] %s1835_s29 }
  0x3d   :  { %2387 = vmatpush3.bf16.msra.mxu1 %v2983_v5  ;;  %v2992_v13 = vpack.c.bf16 %v71_v11, %v70_v10  ;;  %v72_v16 = vld [vmem:[#allocation5 + $0x20] sm:$0xff]  ;;  %v73_v17 = vld [vmem:[#allocation5 + $0x28] sm:$0xff]  ;;  %v2996_v18 = vpack.c.bf16 %v82_v15, %v81_v14  ;;  %v83_v20 = vld [vmem:[#allocation7 + $0x30] sm:$0xff]  ;;  %s2886_s30 = smov [#allocation11]  }
  0x3e   :  { %2375 = vmatpush3.bf16.msra.mxu0 %v2985_v9  ;;  %2388 = vmatprep.subr.bf16.mxu1 %v2879_v0  ;;  %v3000_v19 = vpack.c.bf16 %v73_v17, %v72_v16  ;;  %v84_v21 = vld [vmem:[#allocation7 + $0x38] sm:$0xff]  ;;  %v74_v22 = vld [vmem:[#allocation5 + $0x30] sm:$0xff]  ;;  %s1860_s9 = sshll.u32 %s2886_s30, 4  ;;  %s1861_s9 = int_to_ptr.vmem [resolvable:$true] %s1860_s9 }
  0x3f   :  { %2376 = vmatprep.subr.bf16.mxu0 %v2879_v0  ;;  %v75_v23 = vld [vmem:[#allocation5 + $0x38] sm:$0xff]  ;;  %v3004_v24 = vpack.c.bf16 %v84_v21, %v83_v20  ;;  %v86_v27 = vld [vmem:[#allocation2] sm:$0x3]  ;;  %v312_v6 = vld [vmem:[#allocation2 + $0x2] sm:$0x3] }
  0x40   :  { %v3008_v25 = vpack.c.bf16 %v75_v23, %v74_v22  ;;  %v194_v26 = vld [vmem:[#allocation2 + $0xe] sm:$0x3]  ;;  %v88_v29 = vsel %vm87_vm1, %v86_v27, 0.0  ;;  %v3042_v30 = vld [vmem:[%s3479_s4] ss:$0 sm:$0xff] }
  0x41   :  { %2390 = vmatpush3.bf16.msra.mxu1 %v2988_v12  ;;  %v195_v28 = vsel %vm87_vm1, %v194_v26, 0.0  ;;  %v3047_v31 = vld [vmem:[%s3477_s2] ss:$0 sm:$0xff]  ;;  %v415_v2 = vld [vmem:[#allocation2 + $0xc] sm:$0x3]  ;;  %s2883_s2 = smov [#allocation9]  }
  0x42   :  { %2378 = vmatpush3.bf16.msra.mxu0 %v2992_v13  ;;  %2391 = vmatprep.subr.bf16.mxu1 %v2879_v0  ;;  %s1847_s4 = sshll.u32 %s2883_s2, 4  ;;  %s1848_s4 = int_to_ptr.vmem [resolvable:$true] %s1847_s4 }
  0x43   :  { %2379 = vmatprep.subr.bf16.mxu0 %v2879_v0  ;;  %s2774_s10 = scalar_lea.vmem %s1848_s4, 256  ;;  %p2779_p11 = scmp.lt.s32.totalorder %s1848_s4, %s1848_s4 }
  0x44   :  { %p2775_p10 = scmp.ne.s32.totalorder %s1848_s4, %s2774_s10  ;;  %p2780_p12 = scmp.lt.s32.totalorder %s2774_s10, %s2774_s10 }
  0x45   :  { %2393 = vmatpush3.bf16.msra.mxu1 %v2996_v18 }
  0x46   :  { %2381 = vmatpush3.bf16.msra.mxu0 %v3000_v19  ;;  %2394 = vmatprep.subr.bf16.mxu1 %v2879_v0  ;;  %p2781_p13 = por %p2780_p12, %p2779_p11 }
  0x47   :  { %2382 = vmatprep.subr.bf16.mxu0 %v2879_v0 }
  0x48   :  { %p2782_p0 = pnand %p2781_p13, %p2775_p10 }
  0x49   :  { %2396 = vmatpush3.bf16.msra.mxu1 %v3004_v24 }
  0x4a   :  { %2384 = vmatpush3.bf16.msra.mxu0 %v3008_v25  ;;  %2409 = vmatprep.subr.bf16.mxu1 %v2879_v0 }
  0x4b   :  { %2397 = vmatprep.subr.bf16.mxu0 %v2879_v0 }
  0x4c   :  { %2105 = vmatmul.mubr.msk.f32.vlgmr.msra.gmra.mrb[0].mxu1 %vm95_vm2, %v195_v28 }
  0x4d   :  { %2086 = vmatmul.mubr.msk.f32.vlgmr.msra.gmra.mrb[0].mxu0 %vm95_vm2, %v88_v29  ;;  %2411 = vmatpush3.bf16.msra.mxu1 %v2983_v5 }
  0x4e   :  { %2412 = vmatprep.subr.bf16.mxu1 %v2879_v0  ;;  %2399 = vmatpush3.bf16.msra.mxu0 %v2985_v9 }
  0x4f   :  { %2400 = vmatprep.subr.bf16.mxu0 %v2879_v0  ;;  %2142 = vmatprep.mubr.msk.f32.mxu1 %vm2880_vm0, %v2881_v1 }
  0x50   :  { %2123 = vmatprep.mubr.msk.f32.mxu0 %vm2880_vm0, %v2881_v1 }
  0x51   :  { %2414 = vmatpush3.bf16.msra.mxu1 %v2988_v12 }
  0x52   :  { %2415 = vmatprep.subr.bf16.mxu1 %v2879_v0  ;;  %2402 = vmatpush3.bf16.msra.mxu0 %v2992_v13 }
  0x53   :  { %2403 = vmatprep.subr.bf16.mxu0 %v2879_v0 }
  0x55   :  { %2417 = vmatpush3.bf16.msra.mxu1 %v2996_v18 }
  0x56   :  { %2418 = vmatprep.subr.bf16.mxu1 %v2879_v0  ;;  %2405 = vmatpush3.bf16.msra.mxu0 %v3000_v19 }
  0x57   :  { %2406 = vmatprep.subr.bf16.mxu0 %v2879_v0 }
  0x59   :  { %2420 = vmatpush3.bf16.msra.mxu1 %v3004_v24 }
  0x5a   :  { %2408 = vmatpush3.bf16.msra.mxu0 %v3008_v25  ;;  %2433 = vmatprep.subr.bf16.mxu1 %v2879_v0 }
  0x5b   :  { %2421 = vmatprep.subr.bf16.mxu0 %v2879_v0 }
 0x11f   :  { %v271_v32 = vpop.f32.mrb[0].mxu1 }
 0x120   :  { %v272_v33 = vadd.f32 %v3042_v30, %v271_v32  ;;  %v2106_v34 = vpop.f32.mrb[1].mxu1  ;;  %v165_v35 = vpop.f32.mrb[0].mxu0 }
 0x121   :  { %v166_v36 = vadd.f32 %v3047_v31, %v165_v35  ;;  %v2087_v37 = vpop.f32.mrb[1].mxu0 }
 0x122   :  { %2580 = vtanh.f32 %v272_v33  ;;  %v1896_v40 = vmul.f32 -1.442695, %v272_v33 }
 0x123   :  { %2582 = vtanh.f32 %v166_v36  ;;  %v1893_v41 = vmul.f32 -1.442695, %v166_v36 }
 0x124   :  { %2584 = vpow2.f32 %v1896_v40 }
 0x125   :  { %2586 = vpow2.f32 %v1893_v41 }
 0x12c   :  { %v2581_v38 = vpop.eup %2580 }
 0x12d   :  { %284 = vrot.lane.b32.xlu0 %v2581_v38, %s2882_s24  ;;  %v2583_v39 = vpop.eup %2582 }
 0x12e   :  { %v2585_v42 = vpop.eup %2584 }
 0x12f   :  { %v278_v43 = vadd.f32 1.0, %v2585_v42  ;;  %v2587_v44 = vpop.eup %2586 }
 0x130   :  { %v172_v45 = vadd.f32 1.0, %v2587_v44 }
 0x131   :  { %178 = vrot.lane.b32.xlu0 %v2583_v39, %s2882_s24  ;;  %2588 = vrcp.f32 %v278_v43 }
 0x132   :  { %2590 = vrcp.f32 %v172_v45 }
 0x13b   :  { %v2589_v46 = vpop.eup %2588 }
 0x13c   :  { %v2591_v49 = vpop.eup %2590  ;;  %v282_v52 = vmul.f32 0.0, %v2589_v46 }
 0x13d   :  { %v176_v55 = vmul.f32 0.0, %v2591_v49 }
 0x19f   :  { %v285_v47 = vpop.permute.xlu0 %284 }
 0x1a0   :  { %v287_v48 = vmul.f32 %v2589_v46, %v285_v47 }
 0x1a2   :  { %289 = vrot.lane.b32.xlu1 %v287_v48, %s2876_s1 }
 0x1a3   :  { %v179_v50 = vpop.permute.xlu0 %178 }
 0x1a4   :  { %v181_v51 = vmul.f32 %v2591_v49, %v179_v50  ;;  %v633_v50 = vld [vmem:[#allocation2 + $0xa] sm:$0x3] }
 0x1a6   :  { %183 = vrot.lane.b32.xlu1 %v181_v51, %s2876_s1 }
 0x214   :  { %v290_v53 = vpop.permute.xlu1 %289 }
 0x215   :  { %v3055_v54 = vadd.f32 %v290_v53, %v282_v52  ;;  %v530_v53 = vld [vmem:[#allocation2 + $0x4] sm:$0x3] }
 0x217   :  { %2592 = vtanh.f32 %v3055_v54 }
 0x218   :  { %v184_v56 = vpop.permute.xlu1 %183 }
 0x219   :  { %v3058_v57 = vadd.f32 %v184_v56, %v176_v55 }
 0x21b   :  { %2594 = vtanh.f32 %v3058_v57 }
 0x221   :  { %v2593_v58 = vpop.eup %2592 }
 0x222   :  { %295 = vrot.lane.b32.xlu0 %v2593_v58, %s2882_s24 }
 0x225   :  { %v2595_v59 = vpop.eup %2594 }
 0x226   :  { %189 = vrot.lane.b32.xlu1 %v2595_v59, %s2882_s24 }
 0x294   :  { %v296_v60 = vpop.permute.xlu0 %295 }
 0x295   :  { %v3063_v61 = vmul.f32 %v2589_v46, %v296_v60 }
 0x297   :  { %416 = vrot.lane.b32.xlu0 %v3063_v61, %s2882_s24 }
 0x298   :  { %v190_v62 = vpop.permute.xlu1 %189 }
 0x299   :  { %v3067_v63 = vmul.f32 %v2591_v49, %v190_v62 }
 0x29b   :  { %313 = vrot.lane.b32.xlu1 %v3067_v63, %s2882_s24 }
 0x309   :  { %v417_v3 = vpop.permute.xlu0 %416 }
 0x30a   :  { %v419_v4 = vsel %vm87_vm1, %v415_v2, %v417_v3 }
 0x30b   :  { %2143 = vmatmul.mubr.msk.f32.vlgmr.msra.gmra.mrb[2].mxu1 %vm95_vm2, %v419_v4 }
 0x30c   :  { %2435 = vmatpush3.bf16.msra.mxu1 %v2983_v5  ;;  %2180 = vmatprep.mubr.msk.f32.mxu1 %vm2880_vm0, %v2881_v1 }
 0x30d   :  { %v314_v7 = vpop.permute.xlu1 %313  ;;  %2436 = vmatprep.subr.bf16.mxu1 %v2879_v0 }
 0x30e   :  { %v316_v8 = vsel %vm87_vm1, %v312_v6, %v314_v7 }
 0x30f   :  { %2124 = vmatmul.mubr.msk.f32.vlgmr.msra.gmra.mrb[2].mxu0 %vm95_vm2, %v316_v8 }
 0x310   :  { %2423 = vmatpush3.bf16.msra.mxu0 %v2985_v9  ;;  %2438 = vmatpush3.bf16.msra.mxu1 %v2988_v12 }
 0x311   :  { %2424 = vmatprep.subr.bf16.mxu0 %v2879_v0  ;;  %2439 = vmatprep.subr.bf16.mxu1 %v2879_v0 }
 0x312   :  { %2161 = vmatprep.mubr.msk.f32.mxu0 %vm2880_vm0, %v2881_v1 }
 0x314   :  { %2426 = vmatpush3.bf16.msra.mxu0 %v2992_v13  ;;  %2441 = vmatpush3.bf16.msra.mxu1 %v2996_v18 }
 0x315   :  { %2427 = vmatprep.subr.bf16.mxu0 %v2879_v0  ;;  %2442 = vmatprep.subr.bf16.mxu1 %v2879_v0 }
 0x318   :  { %2429 = vmatpush3.bf16.msra.mxu0 %v3000_v19  ;;  %2444 = vmatpush3.bf16.msra.mxu1 %v3004_v24 }
 0x319   :  { %2430 = vmatprep.subr.bf16.mxu0 %v2879_v0  ;;  %2457 = vmatprep.subr.bf16.mxu1 %v2879_v0 }
 0x31c   :  { %2432 = vmatpush3.bf16.msra.mxu0 %v3008_v25 }
 0x31d   :  { %2445 = vmatprep.subr.bf16.mxu0 %v2879_v0 }
 0x3de   :  { %v489_v10 = vpop.f32.mrb[2].mxu1 }
 0x3df   :  { %v490_v11 = vadd.f32 %v3042_v30, %v489_v10  ;;  %v2144_v14 = vpop.f32.mrb[3].mxu1 }
 0x3e1   :  { %2596 = vtanh.f32 %v490_v11  ;;  %v1900_v22 = vmul.f32 -1.442695, %v490_v11 }
 0x3e2   :  { %v386_v15 = vpop.f32.mrb[2].mxu0 }
 0x3e3   :  { %v387_v16 = vadd.f32 %v3047_v31, %v386_v15  ;;  %v2125_v17 = vpop.f32.mrb[3].mxu0 }
 0x3e5   :  { %2598 = vtanh.f32 %v387_v16  ;;  %v1898_v23 = vmul.f32 -1.442695, %v387_v16 }
 0x3e6   :  { %2600 = vpow2.f32 %v1900_v22 }
 0x3e7   :  { %2602 = vpow2.f32 %v1898_v23 }
 0x3eb   :  { %v2597_v20 = vpop.eup %2596 }
 0x3ec   :  { %502 = vrot.lane.b32.xlu0 %v2597_v20, %s2882_s24 }
 0x3ef   :  { %v2599_v21 = vpop.eup %2598 }
 0x3f0   :  { %399 = vrot.lane.b32.xlu1 %v2599_v21, %s2882_s24  ;;  %v2601_v26 = vpop.eup %2600 }
 0x3f1   :  { %v496_v27 = vadd.f32 1.0, %v2601_v26  ;;  %v2603_v28 = vpop.eup %2602 }
 0x3f2   :  { %v393_v29 = vadd.f32 1.0, %v2603_v28 }
 0x3f3   :  { %2604 = vrcp.f32 %v496_v27 }
 0x3f4   :  { %2606 = vrcp.f32 %v393_v29 }
 0x3fd   :  { %v2605_v32 = vpop.eup %2604 }
 0x3fe   :  { %v2607_v35 = vpop.eup %2606  ;;  %v500_v38 = vmul.f32 %v2605_v32, %v3055_v54 }
 0x3ff   :  { %v397_v41 = vmul.f32 %v2607_v35, %v3058_v57 }
 0x45e   :  { %v503_v33 = vpop.permute.xlu0 %502 }
 0x45f   :  { %v505_v34 = vmul.f32 %v2605_v32, %v503_v33 }
 0x461   :  { %507 = vrot.lane.b32.xlu0 %v505_v34, %s2876_s1 }
 0x462   :  { %v400_v36 = vpop.permute.xlu1 %399 }
 0x463   :  { %v402_v37 = vmul.f32 %v2607_v35, %v400_v36 }
 0x465   :  { %404 = vrot.lane.b32.xlu1 %v402_v37, %s2876_s1 }
 0x4d3   :  { %v508_v39 = vpop.permute.xlu0 %507 }
 0x4d4   :  { %v3102_v40 = vadd.f32 %v508_v39, %v500_v38  ;;  %v851_v38 = vld [vmem:[#allocation2 + $0x8] sm:$0x3] }
 0x4d6   :  { %2608 = vtanh.f32 %v3102_v40 }
 0x4d7   :  { %v405_v42 = vpop.permute.xlu1 %404 }
 0x4d8   :  { %v3106_v43 = vadd.f32 %v405_v42, %v397_v41  ;;  %v748_v41 = vld [vmem:[#allocation2 + $0x6] sm:$0x3] }
 0x4da   :  { %2610 = vtanh.f32 %v3106_v43 }
 0x4e0   :  { %v2609_v44 = vpop.eup %2608 }
 0x4e1   :  { %513 = vrot.lane.b32.xlu0 %v2609_v44, %s2882_s24 }
 0x4e4   :  { %v2611_v45 = vpop.eup %2610 }
 0x4e5   :  { %410 = vrot.lane.b32.xlu1 %v2611_v45, %s2882_s24 }
 0x553   :  { %v514_v46 = vpop.permute.xlu0 %513 }
 0x554   :  { %v3111_v47 = vmul.f32 %v2605_v32, %v514_v46 }
 0x556   :  { %634 = vrot.lane.b32.xlu0 %v3111_v47, %s2882_s24 }
 0x557   :  { %v411_v48 = vpop.permute.xlu1 %410 }
 0x558   :  { %v3115_v49 = vmul.f32 %v2607_v35, %v411_v48 }
 0x55a   :  { %531 = vrot.lane.b32.xlu1 %v3115_v49, %s2882_s24 }
 0x5c8   :  { %v635_v51 = vpop.permute.xlu0 %634 }
 0x5c9   :  { %v637_v52 = vsel %vm87_vm1, %v633_v50, %v635_v51 }
 0x5ca   :  { %2181 = vmatmul.mubr.msk.f32.vlgmr.msra.gmra.mrb[4].mxu1 %vm95_vm2, %v637_v52 }
 0x5cb   :  { %2459 = vmatpush3.bf16.msra.mxu1 %v2983_v5  ;;  %2218 = vmatprep.mubr.msk.f32.mxu1 %vm2880_vm0, %v2881_v1 }
 0x5cc   :  { %v532_v54 = vpop.permute.xlu1 %531  ;;  %2460 = vmatprep.subr.bf16.mxu1 %v2879_v0 }
 0x5cd   :  { %v534_v55 = vsel %vm87_vm1, %v530_v53, %v532_v54 }
 0x5ce   :  { %2162 = vmatmul.mubr.msk.f32.vlgmr.msra.gmra.mrb[4].mxu0 %vm95_vm2, %v534_v55 }
 0x5cf   :  { %2447 = vmatpush3.bf16.msra.mxu0 %v2985_v9  ;;  %2462 = vmatpush3.bf16.msra.mxu1 %v2988_v12 }
 0x5d0   :  { %2448 = vmatprep.subr.bf16.mxu0 %v2879_v0  ;;  %2463 = vmatprep.subr.bf16.mxu1 %v2879_v0 }
 0x5d1   :  { %2199 = vmatprep.mubr.msk.f32.mxu0 %vm2880_vm0, %v2881_v1 }
 0x5d3   :  { %2450 = vmatpush3.bf16.msra.mxu0 %v2992_v13  ;;  %2465 = vmatpush3.bf16.msra.mxu1 %v2996_v18 }
 0x5d4   :  { %2451 = vmatprep.subr.bf16.mxu0 %v2879_v0  ;;  %2466 = vmatprep.subr.bf16.mxu1 %v2879_v0 }
 0x5d7   :  { %2453 = vmatpush3.bf16.msra.mxu0 %v3000_v19  ;;  %2468 = vmatpush3.bf16.msra.mxu1 %v3004_v24 }
 0x5d8   :  { %2454 = vmatprep.subr.bf16.mxu0 %v2879_v0  ;;  %2481 = vmatprep.subr.bf16.mxu1 %v2879_v0 }
 0x5db   :  { %2456 = vmatpush3.bf16.msra.mxu0 %v3008_v25 }
 0x5dc   :  { %2469 = vmatprep.subr.bf16.mxu0 %v2879_v0 }
 0x69d   :  { %v707_v56 = vpop.f32.mrb[4].mxu1 }
 0x69e   :  { %v708_v57 = vadd.f32 %v3042_v30, %v707_v56  ;;  %v2182_v58 = vpop.f32.mrb[5].mxu1 }
 0x6a0   :  { %2612 = vtanh.f32 %v708_v57  ;;  %v1904_v4 = vmul.f32 -1.442695, %v708_v57 }
 0x6a1   :  { %v604_v59 = vpop.f32.mrb[4].mxu0 }
 0x6a2   :  { %v605_v60 = vadd.f32 %v3047_v31, %v604_v59  ;;  %v2163_v62 = vpop.f32.mrb[5].mxu0 }
 0x6a4   :  { %2614 = vtanh.f32 %v605_v60  ;;  %v1902_v6 = vmul.f32 -1.442695, %v605_v60 }
 0x6a5   :  { %2616 = vpow2.f32 %v1904_v4 }
 0x6a6   :  { %2618 = vpow2.f32 %v1902_v6 }
 0x6aa   :  { %v2613_v2 = vpop.eup %2612 }
 0x6ab   :  { %720 = vrot.lane.b32.xlu0 %v2613_v2, %s2882_s24 }
 0x6ae   :  { %v2615_v3 = vpop.eup %2614 }
 0x6af   :  { %617 = vrot.lane.b32.xlu1 %v2615_v3, %s2882_s24  ;;  %v2617_v7 = vpop.eup %2616 }
 0x6b0   :  { %v714_v8 = vadd.f32 1.0, %v2617_v7  ;;  %v2619_v10 = vpop.eup %2618 }
 0x6b1   :  { %v611_v11 = vadd.f32 1.0, %v2619_v10 }
 0x6b2   :  { %2620 = vrcp.f32 %v714_v8 }
 0x6b3   :  { %2622 = vrcp.f32 %v611_v11 }
 0x6bc   :  { %v2621_v14 = vpop.eup %2620 }
 0x6bd   :  { %v2623_v17 = vpop.eup %2622  ;;  %v718_v22 = vmul.f32 %v2621_v14, %v3102_v40 }
 0x6be   :  { %v615_v27 = vmul.f32 %v2623_v17, %v3106_v43 }
 0x71d   :  { %v721_v15 = vpop.permute.xlu0 %720 }
 0x71e   :  { %v723_v16 = vmul.f32 %v2621_v14, %v721_v15 }
 0x720   :  { %725 = vrot.lane.b32.xlu0 %v723_v16, %s2876_s1 }
 0x721   :  { %v618_v20 = vpop.permute.xlu1 %617 }
 0x722   :  { %v620_v21 = vmul.f32 %v2623_v17, %v618_v20 }
 0x724   :  { %622 = vrot.lane.b32.xlu1 %v620_v21, %s2876_s1 }
 0x792   :  { %v726_v23 = vpop.permute.xlu0 %725 }
 0x793   :  { %v3150_v26 = vadd.f32 %v726_v23, %v718_v22 }
 0x795   :  { %2624 = vtanh.f32 %v3150_v26 }
 0x796   :  { %v623_v28 = vpop.permute.xlu1 %622 }
 0x797   :  { %v3154_v29 = vadd.f32 %v623_v28, %v615_v27 }
 0x799   :  { %2626 = vtanh.f32 %v3154_v29 }
 0x79f   :  { %v2625_v32 = vpop.eup %2624 }
 0x7a0   :  { %731 = vrot.lane.b32.xlu0 %v2625_v32, %s2882_s24 }
 0x7a3   :  { %v2627_v33 = vpop.eup %2626 }
 0x7a4   :  { %628 = vrot.lane.b32.xlu1 %v2627_v33, %s2882_s24 }
 0x812   :  { %v732_v34 = vpop.permute.xlu0 %731 }
 0x813   :  { %v3159_v35 = vmul.f32 %v2621_v14, %v732_v34 }
 0x815   :  { %852 = vrot.lane.b32.xlu0 %v3159_v35, %s2882_s24 }
 0x816   :  { %v629_v36 = vpop.permute.xlu1 %628 }
 0x817   :  { %v3163_v37 = vmul.f32 %v2623_v17, %v629_v36 }
 0x819   :  { %749 = vrot.lane.b32.xlu1 %v3163_v37, %s2882_s24 }
 0x887   :  { %v853_v39 = vpop.permute.xlu0 %852 }
 0x888   :  { %v855_v40 = vsel %vm87_vm1, %v851_v38, %v853_v39 }
 0x889   :  { %2219 = vmatmul.mubr.msk.f32.vlgmr.msra.gmra.mrb[6].mxu1 %vm95_vm2, %v855_v40 }
 0x88a   :  { %2483 = vmatpush3.bf16.msra.mxu1 %v2983_v5  ;;  %2256 = vmatprep.mubr.msk.f32.mxu1 %vm2880_vm0, %v2881_v1 }
 0x88b   :  { %v750_v42 = vpop.permute.xlu1 %749  ;;  %2484 = vmatprep.subr.bf16.mxu1 %v2879_v0 }
 0x88c   :  { %v752_v43 = vsel %vm87_vm1, %v748_v41, %v750_v42 }
 0x88d   :  { %2200 = vmatmul.mubr.msk.f32.vlgmr.msra.gmra.mrb[6].mxu0 %vm95_vm2, %v752_v43 }
 0x88e   :  { %2471 = vmatpush3.bf16.msra.mxu0 %v2985_v9  ;;  %2486 = vmatpush3.bf16.msra.mxu1 %v2988_v12 }
 0x88f   :  { %2472 = vmatprep.subr.bf16.mxu0 %v2879_v0  ;;  %2487 = vmatprep.subr.bf16.mxu1 %v2879_v0 }
 0x890   :  { %2237 = vmatprep.mubr.msk.f32.mxu0 %vm2880_vm0, %v2881_v1 }
 0x892   :  { %2474 = vmatpush3.bf16.msra.mxu0 %v2992_v13  ;;  %2489 = vmatpush3.bf16.msra.mxu1 %v2996_v18 }
 0x893   :  { %2475 = vmatprep.subr.bf16.mxu0 %v2879_v0  ;;  %2490 = vmatprep.subr.bf16.mxu1 %v2879_v0 }
 0x896   :  { %2477 = vmatpush3.bf16.msra.mxu0 %v3000_v19  ;;  %2492 = vmatpush3.bf16.msra.mxu1 %v3004_v24 }
 0x897   :  { %2478 = vmatprep.subr.bf16.mxu0 %v2879_v0  ;;  %2505 = vmatprep.subr.bf16.mxu1 %v2879_v0 }
 0x89a   :  { %2480 = vmatpush3.bf16.msra.mxu0 %v3008_v25 }
 0x89b   :  { %2493 = vmatprep.subr.bf16.mxu0 %v2879_v0 }
 0x95c   :  { %v925_v44 = vpop.f32.mrb[6].mxu1 }
 0x95d   :  { %v926_v45 = vadd.f32 %v3042_v30, %v925_v44  ;;  %v2220_v46 = vpop.f32.mrb[7].mxu1 }
 0x95f   :  { %2628 = vtanh.f32 %v926_v45  ;;  %v1908_v54 = vmul.f32 -1.442695, %v926_v45 }
 0x960   :  { %v822_v48 = vpop.f32.mrb[6].mxu0 }
 0x961   :  { %v823_v50 = vadd.f32 %v3047_v31, %v822_v48  ;;  %v2201_v51 = vpop.f32.mrb[7].mxu0 }
 0x963   :  { %2630 = vtanh.f32 %v823_v50  ;;  %v1906_v55 = vmul.f32 -1.442695, %v823_v50 }
 0x964   :  { %2632 = vpow2.f32 %v1908_v54 }
 0x965   :  { %2634 = vpow2.f32 %v1906_v55 }
 0x969   :  { %v2629_v52 = vpop.eup %2628 }
 0x96a   :  { %938 = vrot.lane.b32.xlu0 %v2629_v52, %s2882_s24 }
 0x96d   :  { %v2631_v53 = vpop.eup %2630 }
 0x96e   :  { %835 = vrot.lane.b32.xlu1 %v2631_v53, %s2882_s24  ;;  %v2633_v56 = vpop.eup %2632 }
 0x96f   :  { %v932_v57 = vadd.f32 1.0, %v2633_v56  ;;  %v2635_v58 = vpop.eup %2634 }
 0x970   :  { %v829_v59 = vadd.f32 1.0, %v2635_v58 }
 0x971   :  { %2636 = vrcp.f32 %v932_v57 }
 0x972   :  { %2638 = vrcp.f32 %v829_v59 }
 0x97b   :  { %v2637_v60 = vpop.eup %2636 }
 0x97c   :  { %v2639_v3 = vpop.eup %2638  ;;  %v936_v7 = vmul.f32 %v2637_v60, %v3150_v26  ;;  %v1067_v26 = vld [vmem:[#allocation2 + $0x6] sm:$0x3] }
 0x97d   :  { %v833_v11 = vmul.f32 %v2639_v3, %v3154_v29  ;;  %v965_v29 = vld [vmem:[#allocation2 + $0x8] sm:$0x3] }
 0x9dc   :  { %v939_v62 = vpop.permute.xlu0 %938 }
 0x9dd   :  { %v941_v2 = vmul.f32 %v2637_v60, %v939_v62 }
 0x9df   :  { %943 = vrot.lane.b32.xlu0 %v941_v2, %s2876_s1 }
 0x9e0   :  { %v836_v4 = vpop.permute.xlu1 %835 }
 0x9e1   :  { %v838_v6 = vmul.f32 %v2639_v3, %v836_v4 }
 0x9e3   :  { %840 = vrot.lane.b32.xlu1 %v838_v6, %s2876_s1 }
 0xa51   :  { %v944_v8 = vpop.permute.xlu0 %943 }
 0xa52   :  { %v3198_v10 = vadd.f32 %v944_v8, %v936_v7 }
 0xa54   :  { %2640 = vtanh.f32 %v3198_v10 }
 0xa55   :  { %v841_v14 = vpop.permute.xlu1 %840 }
 0xa56   :  { %v3202_v15 = vadd.f32 %v841_v14, %v833_v11  ;;  %v1283_v14 = vld [vmem:[#allocation2 + $0x4] sm:$0x3] }
 0xa58   :  { %2642 = vtanh.f32 %v3202_v15 }
 0xa5e   :  { %v2641_v16 = vpop.eup %2640 }
 0xa5f   :  { %949 = vrot.lane.b32.xlu0 %v2641_v16, %s2882_s24 }
 0xa62   :  { %v2643_v17 = vpop.eup %2642 }
 0xa63   :  { %846 = vrot.lane.b32.xlu1 %v2643_v17, %s2882_s24  ;;  %v1181_v17 = vld [vmem:[#allocation2 + $0xa] sm:$0x3] }
 0xad1   :  { %v950_v20 = vpop.permute.xlu0 %949 }
 0xad2   :  { %v3207_v21 = vmul.f32 %v2637_v60, %v950_v20 }
 0xad4   :  { %1068 = vrot.lane.b32.xlu0 %v3207_v21, %s2882_s24 }
 0xad5   :  { %v847_v22 = vpop.permute.xlu1 %846 }
 0xad6   :  { %v3211_v23 = vmul.f32 %v2639_v3, %v847_v22 }
 0xad8   :  { %966 = vrot.lane.b32.xlu1 %v3211_v23, %s2882_s24 }
 0xb46   :  { %v1069_v27 = vpop.permute.xlu0 %1068 }
 0xb47   :  { %v1071_v28 = vsel %vm87_vm1, %v1067_v26, %v1069_v27 }
 0xb48   :  { %2257 = vmatmul.mubr.msk.f32.vlgmr.msra.gmra.mrb[8].mxu1 %vm95_vm2, %v1071_v28 }
 0xb49   :  { %2507 = vmatpush3.bf16.msra.mxu1 %v2983_v5  ;;  %2294 = vmatprep.mubr.msk.f32.mxu1 %vm2880_vm0, %v2881_v1 }
 0xb4a   :  { %v967_v32 = vpop.permute.xlu1 %966  ;;  %2508 = vmatprep.subr.bf16.mxu1 %v2879_v0 }
 0xb4b   :  { %v969_v33 = vsel %vm87_vm1, %v965_v29, %v967_v32 }
 0xb4c   :  { %2238 = vmatmul.mubr.msk.f32.vlgmr.msra.gmra.mrb[8].mxu0 %vm95_vm2, %v969_v33 }
 0xb4d   :  { %2495 = vmatpush3.bf16.msra.mxu0 %v2985_v9  ;;  %2510 = vmatpush3.bf16.msra.mxu1 %v2988_v12 }
 0xb4e   :  { %2496 = vmatprep.subr.bf16.mxu0 %v2879_v0  ;;  %2511 = vmatprep.subr.bf16.mxu1 %v2879_v0 }
 0xb4f   :  { %2275 = vmatprep.mubr.msk.f32.mxu0 %vm2880_vm0, %v2881_v1 }
 0xb51   :  { %2498 = vmatpush3.bf16.msra.mxu0 %v2992_v13  ;;  %2513 = vmatpush3.bf16.msra.mxu1 %v2996_v18 }
 0xb52   :  { %2499 = vmatprep.subr.bf16.mxu0 %v2879_v0  ;;  %2514 = vmatprep.subr.bf16.mxu1 %v2879_v0 }
 0xb55   :  { %2501 = vmatpush3.bf16.msra.mxu0 %v3000_v19  ;;  %2516 = vmatpush3.bf16.msra.mxu1 %v3004_v24 }
 0xb56   :  { %2502 = vmatprep.subr.bf16.mxu0 %v2879_v0  ;;  %2529 = vmatprep.subr.bf16.mxu1 %v2879_v0 }
 0xb59   :  { %2504 = vmatpush3.bf16.msra.mxu0 %v3008_v25 }
 0xb5a   :  { %2517 = vmatprep.subr.bf16.mxu0 %v2879_v0 }
 0xc1b   :  { %v1141_v34 = vpop.f32.mrb[8].mxu1 }
 0xc1c   :  { %v1142_v36 = vadd.f32 %v3042_v30, %v1141_v34  ;;  %v2258_v38 = vpop.f32.mrb[9].mxu1 }
 0xc1e   :  { %2644 = vtanh.f32 %v1142_v36  ;;  %v1912_v44 = vmul.f32 -1.442695, %v1142_v36 }
 0xc1f   :  { %v1039_v39 = vpop.f32.mrb[8].mxu0 }
 0xc20   :  { %v1040_v40 = vadd.f32 %v3047_v31, %v1039_v39  ;;  %v2239_v41 = vpop.f32.mrb[9].mxu0 }
 0xc22   :  { %2646 = vtanh.f32 %v1040_v40  ;;  %v1910_v45 = vmul.f32 -1.442695, %v1040_v40 }
 0xc23   :  { %2648 = vpow2.f32 %v1912_v44 }
 0xc24   :  { %2650 = vpow2.f32 %v1910_v45 }
 0xc28   :  { %v2645_v42 = vpop.eup %2644 }
 0xc29   :  { %1154 = vrot.lane.b32.xlu0 %v2645_v42, %s2882_s24 }
 0xc2c   :  { %v2647_v43 = vpop.eup %2646 }
 0xc2d   :  { %1052 = vrot.lane.b32.xlu1 %v2647_v43, %s2882_s24  ;;  %v2649_v46 = vpop.eup %2648 }
 0xc2e   :  { %v1148_v48 = vadd.f32 1.0, %v2649_v46  ;;  %v2651_v50 = vpop.eup %2650 }
 0xc2f   :  { %v1046_v51 = vadd.f32 1.0, %v2651_v50 }
 0xc30   :  { %2652 = vrcp.f32 %v1148_v48 }
 0xc31   :  { %2654 = vrcp.f32 %v1046_v51 }
 0xc3a   :  { %v2653_v52 = vpop.eup %2652 }
 0xc3b   :  { %v2655_v55 = vpop.eup %2654  ;;  %v1152_v58 = vmul.f32 %v2653_v52, %v3198_v10 }
 0xc3c   :  { %v1050_v62 = vmul.f32 %v2655_v55, %v3202_v15 }
 0xc9b   :  { %v1155_v53 = vpop.permute.xlu0 %1154 }
 0xc9c   :  { %v1157_v54 = vmul.f32 %v2653_v52, %v1155_v53 }
 0xc9e   :  { %1159 = vrot.lane.b32.xlu0 %v1157_v54, %s2876_s1 }
 0xc9f   :  { %v1053_v56 = vpop.permute.xlu1 %1052 }
 0xca0   :  { %v1055_v57 = vmul.f32 %v2655_v55, %v1053_v56 }
 0xca2   :  { %1057 = vrot.lane.b32.xlu1 %v1055_v57, %s2876_s1 }
 0xd10   :  { %v1160_v59 = vpop.permute.xlu0 %1159 }
 0xd11   :  { %v3246_v60 = vadd.f32 %v1160_v59, %v1152_v58 }
 0xd13   :  { %2656 = vtanh.f32 %v3246_v60 }
 0xd14   :  { %v1058_v2 = vpop.permute.xlu1 %1057 }
 0xd15   :  { %v3250_v3 = vadd.f32 %v1058_v2, %v1050_v62 }
 0xd17   :  { %2658 = vtanh.f32 %v3250_v3 }
 0xd1d   :  { %v2657_v4 = vpop.eup %2656 }
 0xd1e   :  { %1165 = vrot.lane.b32.xlu0 %v2657_v4, %s2882_s24 }
 0xd21   :  { %v2659_v6 = vpop.eup %2658 }
 0xd22   :  { %1063 = vrot.lane.b32.xlu1 %v2659_v6, %s2882_s24 }
 0xd90   :  { %v1166_v7 = vpop.permute.xlu0 %1165 }
 0xd91   :  { %v3255_v8 = vmul.f32 %v2653_v52, %v1166_v7 }
 0xd93   :  { %1284 = vrot.lane.b32.xlu0 %v3255_v8, %s2882_s24 }
 0xd94   :  { %v1064_v10 = vpop.permute.xlu1 %1063 }
 0xd95   :  { %v3259_v11 = vmul.f32 %v2655_v55, %v1064_v10  ;;  %v1397_v10 = vld [vmem:[#allocation2 + $0xc] sm:$0x3] }
 0xd97   :  { %1182 = vrot.lane.b32.xlu1 %v3259_v11, %s2882_s24 }
 0xe05   :  { %v1285_v15 = vpop.permute.xlu0 %1284 }
 0xe06   :  { %v1287_v16 = vsel %vm87_vm1, %v1283_v14, %v1285_v15 }
 0xe07   :  { %2295 = vmatmul.mubr.msk.f32.vlgmr.msra.gmra.mrb[10].mxu1 %vm95_vm2, %v1287_v16 }
 0xe08   :  { %2531 = vmatpush3.bf16.msra.mxu1 %v2983_v5  ;;  %2332 = vmatprep.mubr.msk.f32.mxu1 %vm2880_vm0, %v2881_v1 }
 0xe09   :  { %v1183_v20 = vpop.permute.xlu1 %1182  ;;  %2532 = vmatprep.subr.bf16.mxu1 %v2879_v0 }
 0xe0a   :  { %v1185_v22 = vsel %vm87_vm1, %v1181_v17, %v1183_v20 }
 0xe0b   :  { %2276 = vmatmul.mubr.msk.f32.vlgmr.msra.gmra.mrb[10].mxu0 %vm95_vm2, %v1185_v22 }
 0xe0c   :  { %2519 = vmatpush3.bf16.msra.mxu0 %v2985_v9  ;;  %2534 = vmatpush3.bf16.msra.mxu1 %v2988_v12 }
 0xe0d   :  { %2520 = vmatprep.subr.bf16.mxu0 %v2879_v0  ;;  %2535 = vmatprep.subr.bf16.mxu1 %v2879_v0 }
 0xe0e   :  { %2313 = vmatprep.mubr.msk.f32.mxu0 %vm2880_vm0, %v2881_v1 }
 0xe10   :  { %2522 = vmatpush3.bf16.msra.mxu0 %v2992_v13  ;;  %2537 = vmatpush3.bf16.msra.mxu1 %v2996_v18 }
 0xe11   :  { %2523 = vmatprep.subr.bf16.mxu0 %v2879_v0  ;;  %2538 = vmatprep.subr.bf16.mxu1 %v2879_v0 }
 0xe14   :  { %2525 = vmatpush3.bf16.msra.mxu0 %v3000_v19  ;;  %2540 = vmatpush3.bf16.msra.mxu1 %v3004_v24 }
 0xe15   :  { %2526 = vmatprep.subr.bf16.mxu0 %v2879_v0  ;;  %2553 = vmatprep.subr.bf16.mxu1 %v2879_v0 }
 0xe18   :  { %2528 = vmatpush3.bf16.msra.mxu0 %v3008_v25 }
 0xe19   :  { %2541 = vmatprep.subr.bf16.mxu0 %v2879_v0 }
 0xeda   :  { %v1357_v26 = vpop.f32.mrb[10].mxu1 }
 0xedb   :  { %v1358_v27 = vadd.f32 %v3042_v30, %v1357_v26  ;;  %v2296_v28 = vpop.f32.mrb[11].mxu1 }
 0xedd   :  { %2660 = vtanh.f32 %v1358_v27  ;;  %v1916_v38 = vmul.f32 -1.442695, %v1358_v27 }
 0xede   :  { %v1255_v29 = vpop.f32.mrb[10].mxu0 }
 0xedf   :  { %v1256_v32 = vadd.f32 %v3047_v31, %v1255_v29  ;;  %v2277_v33 = vpop.f32.mrb[11].mxu0 }
 0xee1   :  { %2662 = vtanh.f32 %v1256_v32  ;;  %v1914_v39 = vmul.f32 -1.442695, %v1256_v32 }
 0xee2   :  { %2664 = vpow2.f32 %v1916_v38 }
 0xee3   :  { %2666 = vpow2.f32 %v1914_v39 }
 0xee7   :  { %v2661_v34 = vpop.eup %2660 }
 0xee8   :  { %1370 = vrot.lane.b32.xlu0 %v2661_v34, %s2882_s24 }
 0xeeb   :  { %v2663_v36 = vpop.eup %2662 }
 0xeec   :  { %1268 = vrot.lane.b32.xlu1 %v2663_v36, %s2882_s24  ;;  %v2665_v40 = vpop.eup %2664 }
 0xeed   :  { %v1364_v41 = vadd.f32 1.0, %v2665_v40  ;;  %v2667_v42 = vpop.eup %2666 }
 0xeee   :  { %v1262_v43 = vadd.f32 1.0, %v2667_v42 }
 0xeef   :  { %2668 = vrcp.f32 %v1364_v41 }
 0xef0   :  { %2670 = vrcp.f32 %v1262_v43 }
 0xef9   :  { %v2669_v44 = vpop.eup %2668 }
 0xefa   :  { %v2671_v48 = vpop.eup %2670  ;;  %v1368_v52 = vmul.f32 %v2669_v44, %v3246_v60 }
 0xefb   :  { %v1266_v55 = vmul.f32 %v2671_v48, %v3250_v3  ;;  %v1499_v3 = vld [vmem:[#allocation2 + $0x2] sm:$0x3] }
 0xf5a   :  { %v1371_v45 = vpop.permute.xlu0 %1370 }
 0xf5b   :  { %v1373_v46 = vmul.f32 %v2669_v44, %v1371_v45 }
 0xf5d   :  { %1375 = vrot.lane.b32.xlu0 %v1373_v46, %s2876_s1 }
 0xf5e   :  { %v1269_v50 = vpop.permute.xlu1 %1268 }
 0xf5f   :  { %v1271_v51 = vmul.f32 %v2671_v48, %v1269_v50  ;;  %v1715_v50 = vld [vmem:[#allocation2] sm:$0x3] }
 0xf61   :  { %1273 = vrot.lane.b32.xlu1 %v1271_v51, %s2876_s1 }
 0xfcf   :  { %v1376_v53 = vpop.permute.xlu0 %1375 }
 0xfd0   :  { %v3294_v54 = vadd.f32 %v1376_v53, %v1368_v52  ;;  %v1613_v53 = vld [vmem:[#allocation2 + $0xe] sm:$0x3] }
 0xfd2   :  { %2672 = vtanh.f32 %v3294_v54 }
 0xfd3   :  { %v1274_v56 = vpop.permute.xlu1 %1273 }
 0xfd4   :  { %v3298_v57 = vadd.f32 %v1274_v56, %v1266_v55 }
 0xfd6   :  { %2674 = vtanh.f32 %v3298_v57 }
 0xfdc   :  { %v2673_v58 = vpop.eup %2672 }
 0xfdd   :  { %1381 = vrot.lane.b32.xlu0 %v2673_v58, %s2882_s24 }
 0xfe0   :  { %v2675_v59 = vpop.eup %2674 }
 0xfe1   :  { %1279 = vrot.lane.b32.xlu1 %v2675_v59, %s2882_s24 }
0x104f   :  { %v1382_v62 = vpop.permute.xlu0 %1381 }
0x1050   :  { %v3303_v60 = vmul.f32 %v2669_v44, %v1382_v62 }
0x1052   :  { %1500 = vrot.lane.b32.xlu0 %v3303_v60, %s2882_s24 }
0x1053   :  { %v1280_v2 = vpop.permute.xlu1 %1279 }
0x1054   :  { %v3307_v4 = vmul.f32 %v2671_v48, %v1280_v2 }
0x1056   :  { %1398 = vrot.lane.b32.xlu1 %v3307_v4, %s2882_s24 }
0x10c4   :  { %v1501_v6 = vpop.permute.xlu0 %1500 }
0x10c5   :  { %v1503_v7 = vsel %vm87_vm1, %v1499_v3, %v1501_v6 }
0x10c6   :  { %2333 = vmatmul.mubr.msk.f32.vlgmr.msra.gmra.mrb[12].mxu1 %vm95_vm2, %v1503_v7 }
0x10c7   :  { %2555 = vmatpush3.bf16.msra.mxu1 %v2983_v5  ;;  %2370 = vmatprep.mubr.msk.f32.mxu1 %vm2880_vm0, %v2881_v1 }
0x10c8   :  { %v1399_v14 = vpop.permute.xlu1 %1398  ;;  %2556 = vmatprep.subr.bf16.mxu1 %v2879_v0 }
0x10c9   :  { %v1401_v15 = vsel %vm87_vm1, %v1397_v10, %v1399_v14 }
0x10ca   :  { %2314 = vmatmul.mubr.msk.f32.vlgmr.msra.gmra.mrb[12].mxu0 %vm95_vm2, %v1401_v15 }
0x10cb   :  { %2543 = vmatpush3.bf16.msra.mxu0 %v2985_v9  ;;  %2558 = vmatpush3.bf16.msra.mxu1 %v2988_v12 }
0x10cc   :  { %2544 = vmatprep.subr.bf16.mxu0 %v2879_v0  ;;  %2559 = vmatprep.subr.bf16.mxu1 %v2879_v0 }
0x10cd   :  { %2351 = vmatprep.mubr.msk.f32.mxu0 %vm2880_vm0, %v2881_v1 }
0x10cf   :  { %2546 = vmatpush3.bf16.msra.mxu0 %v2992_v13  ;;  %2561 = vmatpush3.bf16.msra.mxu1 %v2996_v18 }
0x10d0   :  { %2547 = vmatprep.subr.bf16.mxu0 %v2879_v0  ;;  %2562 = vmatprep.subr.bf16.mxu1 %v2879_v0 }
0x10d3   :  { %2549 = vmatpush3.bf16.msra.mxu0 %v3000_v19  ;;  %2564 = vmatpush3.bf16.msra.mxu1 %v3004_v24 }
0x10d4   :  { %2550 = vmatprep.subr.bf16.mxu0 %v2879_v0 }
0x10d7   :  { %2552 = vmatpush3.bf16.msra.mxu0 %v3008_v25 }
0x1199   :  { %v1573_v5 = vpop.f32.mrb[12].mxu1 }
0x119a   :  { %v1574_v9 = vadd.f32 %v3042_v30, %v1573_v5  ;;  %v2334_v1 = vpop.f32.mrb[13].mxu1 }
0x119c   :  { %2676 = vtanh.f32 %v1574_v9  ;;  %v1920_v24 = vmul.f32 -1.442695, %v1574_v9 }
0x119d   :  { %v1471_v12 = vpop.f32.mrb[12].mxu0 }
0x119e   :  { %v1472_v13 = vadd.f32 %v3047_v31, %v1471_v12  ;;  %v2315_v18 = vpop.f32.mrb[13].mxu0 }
0x11a0   :  { %2678 = vtanh.f32 %v1472_v13  ;;  %v1918_v0 = vmul.f32 -1.442695, %v1472_v13 }
0x11a1   :  { %2680 = vpow2.f32 %v1920_v24 }
0x11a2   :  { %2682 = vpow2.f32 %v1918_v0 }
0x11a6   :  { %v2677_v16 = vpop.eup %2676 }
0x11a7   :  { %1586 = vrot.lane.b32.xlu0 %v2677_v16, %s2882_s24 }
0x11aa   :  { %v2679_v19 = vpop.eup %2678 }
0x11ab   :  { %1484 = vrot.lane.b32.xlu1 %v2679_v19, %s2882_s24  ;;  %v2681_v25 = vpop.eup %2680 }
0x11ac   :  { %v1580_v17 = vadd.f32 1.0, %v2681_v25  ;;  %v2683_v20 = vpop.eup %2682 }
0x11ad   :  { %v1478_v22 = vadd.f32 1.0, %v2683_v20 }
0x11ae   :  { %2684 = vrcp.f32 %v1580_v17 }
0x11af   :  { %2686 = vrcp.f32 %v1478_v22 }
0x11b8   :  { %v2685_v26 = vpop.eup %2684 }
0x11b9   :  { %v2687_v29 = vpop.eup %2686  ;;  %v1584_v34 = vmul.f32 %v2685_v26, %v3294_v54 }
0x11ba   :  { %v1482_v39 = vmul.f32 %v2687_v29, %v3298_v57 }
0x1219   :  { %v1587_v27 = vpop.permute.xlu0 %1586 }
0x121a   :  { %v1589_v28 = vmul.f32 %v2685_v26, %v1587_v27 }
0x121c   :  { %1591 = vrot.lane.b32.xlu0 %v1589_v28, %s2876_s1 }
0x121d   :  { %v1485_v32 = vpop.permute.xlu1 %1484 }
0x121e   :  { %v1487_v33 = vmul.f32 %v2687_v29, %v1485_v32 }
0x1220   :  { %1489 = vrot.lane.b32.xlu1 %v1487_v33, %s2876_s1 }
0x128e   :  { %v1592_v36 = vpop.permute.xlu0 %1591 }
0x128f   :  { %v1594_v38 = vadd.f32 %v1592_v36, %v1584_v34 }
0x1291   :  { %2688 = vtanh.f32 %v1594_v38 }
0x1292   :  { %v1490_v40 = vpop.permute.xlu1 %1489 }
0x1293   :  { %v1492_v41 = vadd.f32 %v1490_v40, %v1482_v39 }
0x1295   :  { %2690 = vtanh.f32 %v1492_v41 }
0x129b   :  { %v2689_v42 = vpop.eup %2688 }
0x129c   :  { %1597 = vrot.lane.b32.xlu0 %v2689_v42, %s2882_s24 }
0x129f   :  { %v2691_v43 = vpop.eup %2690 }
0x12a0   :  { %1495 = vrot.lane.b32.xlu1 %v2691_v43, %s2882_s24 }
0x130e   :  { %v1598_v44 = vpop.permute.xlu0 %1597 }
0x130f   :  { %v1600_v45 = vmul.f32 %v2685_v26, %v1598_v44 }
0x1311   :  { %1716 = vrot.lane.b32.xlu0 %v1600_v45, %s2882_s24 }
0x1312   :  { %v1496_v46 = vpop.permute.xlu1 %1495 }
0x1313   :  { %v3344_v48 = vmul.f32 %v2687_v29, %v1496_v46 }
0x1315   :  { %1614 = vrot.lane.b32.xlu1 %v3344_v48, %s2882_s24 }
0x1383   :  { %v1717_v51 = vpop.permute.xlu0 %1716 }
0x1384   :  { %v1719_v52 = vsel %vm87_vm1, %v1715_v50, %v1717_v51 }
0x1385   :  { %2371 = vmatmul.mubr.msk.f32.vlgmr.msra.gmra.mrb[14].mxu1 %vm95_vm2, %v1719_v52 }
0x1387   :  { %v1615_v54 = vpop.permute.xlu1 %1614 }
0x1388   :  { %v1617_v55 = vsel %vm87_vm1, %v1613_v53, %v1615_v54 }
0x1389   :  { %2352 = vmatmul.mubr.msk.f32.vlgmr.msra.gmra.mrb[14].mxu0 %vm95_vm2, %v1617_v55 }
0x1458   :  { %v1789_v56 = vpop.f32.mrb[14].mxu1 }
0x1459   :  { %v1790_v57 = vadd.f32 %v3042_v30, %v1789_v56  ;;  %v2372_v58 = vpop.f32.mrb[15].mxu1 }
0x145b   :  { %2692 = vtanh.f32 %v1790_v57  ;;  %v1924_v7 = vmul.f32 -1.442695, %v1790_v57 }
0x145c   :  { %v1687_v59 = vpop.f32.mrb[14].mxu0 }
0x145d   :  { %v1688_v62 = vadd.f32 %v3047_v31, %v1687_v59  ;;  %v2353_v2 = vpop.f32.mrb[15].mxu0 }
0x145f   :  { %2694 = vtanh.f32 %v1688_v62  ;;  %v1922_v10 = vmul.f32 -1.442695, %v1688_v62 }
0x1460   :  { %2696 = vpow2.f32 %v1924_v7 }
0x1461   :  { %2698 = vpow2.f32 %v1922_v10 }
0x1465   :  { %v2693_v3 = vpop.eup %2692 }
0x1466   :  { %1802 = vrot.lane.b32.xlu0 %v2693_v3, %s2882_s24 }
0x1469   :  { %v2695_v6 = vpop.eup %2694 }
0x146a   :  { %1700 = vrot.lane.b32.xlu1 %v2695_v6, %s2882_s24  ;;  %v2697_v14 = vpop.eup %2696 }
0x146b   :  { %v1796_v15 = vadd.f32 1.0, %v2697_v14  ;;  %v2699_v30 = vpop.eup %2698 }
0x146c   :  { %v1694_v5 = vadd.f32 1.0, %v2699_v30 }
0x146d   :  { %2700 = vrcp.f32 %v1796_v15 }
0x146e   :  { %2702 = vrcp.f32 %v1694_v5 }
0x1477   :  { %v2701_v9 = vpop.eup %2700 }
0x1478   :  { %v2703_v12 = vpop.eup %2702  ;;  %v1800_v16 = vmul.f32 %v2701_v9, %v1594_v38 }
0x1479   :  { %v1698_v0 = vmul.f32 %v2703_v12, %v1492_v41 }
0x14d8   :  { %v1803_v31 = vpop.permute.xlu0 %1802 }
0x14d9   :  { %v1805_v1 = vmul.f32 %v2701_v9, %v1803_v31 }
0x14db   :  { %1807 = vrot.lane.b32.xlu0 %v1805_v1, %s2876_s1 }
0x14dc   :  { %v1701_v13 = vpop.permute.xlu1 %1700 }
0x14dd   :  { %v1703_v18 = vmul.f32 %v2703_v12, %v1701_v13 }
0x14df   :  { %1705 = vrot.lane.b32.xlu1 %v1703_v18, %s2876_s1 }
0x154d   :  { %v1808_v19 = vpop.permute.xlu0 %1807 }
0x154e   :  { %v1810_v24 = vadd.f32 %v1808_v19, %v1800_v16 }
0x1550   :  { %2704 = vtanh.f32 %v1810_v24 }
0x1551   :  { %v1706_v25 = vpop.permute.xlu1 %1705 }
0x1552   :  { %v1708_v17 = vadd.f32 %v1706_v25, %v1698_v0 }
0x1554   :  { %2706 = vtanh.f32 %v1708_v17 }
0x155a   :  { %v2705_v20 = vpop.eup %2704 }
0x155b   :  { %1813 = vrot.lane.b32.xlu0 %v2705_v20, %s2882_s24 }
0x155e   :  { %v2707_v22 = vpop.eup %2706 }
0x155f   :  { %306 = vrot.lane.b32.xlu0 %v3063_v61, %s2876_s1  ;;  %1711 = vrot.lane.b32.xlu1 %v2707_v22, %s2882_s24 }
0x1563   :  { %742 = vrot.lane.b32.xlu0 %v3159_v35, %s2876_s1  ;;  %524 = vrot.lane.b32.xlu1 %v3111_v47, %s2876_s1 }
0x1567   :  { %1176 = vrot.lane.b32.xlu0 %v3255_v8, %s2876_s1  ;;  %960 = vrot.lane.b32.xlu1 %v3207_v21, %s2876_s1 }
0x156b   :  { %1608 = vrot.lane.b32.xlu0 %v1600_v45, %s2876_s1  ;;  %1392 = vrot.lane.b32.xlu1 %v3303_v60, %s2876_s1 }
0x156f   :  { %300 = vrot.lane.b32.xlu0 %v3067_v63, %s2876_s1  ;;  %518 = vrot.lane.b32.xlu1 %v3115_v49, %s2876_s1 }
0x1573   :  { %736 = vrot.lane.b32.xlu0 %v3163_v37, %s2876_s1  ;;  %954 = vrot.lane.b32.xlu1 %v3211_v23, %s2876_s1 }
0x1577   :  { %1170 = vrot.lane.b32.xlu0 %v3259_v11, %s2876_s1  ;;  %1386 = vrot.lane.b32.xlu1 %v3307_v4, %s2876_s1 }
0x157b   :  { %1602 = vrot.lane.b32.xlu0 %v3344_v48, %s2876_s1 }
0x15cd   :  { %v1814_v61 = vpop.permute.xlu0 %1813 }
0x15ce   :  { %v1816_v63 = vmul.f32 %v2701_v9, %v1814_v61 }
0x15d0   :  { %1824 = vrot.lane.b32.xlu1 %v1816_v63, %s2876_s1 }
0x15d1   :  { %v307_v47 = vpop.permute.xlu0 %306  ;;  %v1712_v49 = vpop.permute.xlu1 %1711 }
0x15d2   :  { %310 = vst.msk [vmem:[#allocation9 + $0xe] sm:$0x3] %vm303_vm3, %v307_v47  ;;  %v1714_v35 = vmul.f32 %v2703_v12, %v1712_v49 }
0x15d4   :  { %1818 = vrot.lane.b32.xlu1 %v1714_v35, %s2876_s1 }
0x15d5   :  { %v743_v37 = vpop.permute.xlu0 %742  ;;  %v525_v21 = vpop.permute.xlu1 %524 }
0x15d6   :  { %746 = vst.msk [vmem:[#allocation9 + $0xa] sm:$0x3] %vm303_vm3, %v743_v37  ;;  %528 = vst.msk [vmem:[#allocation9 + $0xc] sm:$0x3] %vm303_vm3, %v525_v21 }
0x15d9   :  { %v1177_v23 = vpop.permute.xlu0 %1176  ;;  %v961_v8 = vpop.permute.xlu1 %960 }
0x15da   :  { %1180 = vst.msk [vmem:[#allocation9 + $0x6] sm:$0x3] %vm303_vm3, %v1177_v23  ;;  %964 = vst.msk [vmem:[#allocation9 + $0x8] sm:$0x3] %vm303_vm3, %v961_v8 }
0x15dd   :  { %v1609_v11 = vpop.permute.xlu0 %1608  ;;  %v1393_v60 = vpop.permute.xlu1 %1392 }
0x15de   :  { %1612 = vst.msk [vmem:[#allocation9 + $0x2] sm:$0x3] %vm303_vm3, %v1609_v11  ;;  %1396 = vst.msk [vmem:[#allocation9 + $0x4] sm:$0x3] %vm303_vm3, %v1393_v60 }
0x15e1   :  { %v301_v4 = vpop.permute.xlu0 %300  ;;  %v519_v26 = vpop.permute.xlu1 %518 }
0x15e2   :  { %304 = vst.msk [vmem:[#allocation8] sm:$0x3] %vm303_vm3, %v301_v4  ;;  %522 = vst.msk [vmem:[#allocation8 + $0x2] sm:$0x3] %vm303_vm3, %v519_v26 }
0x15e5   :  { %v737_v27 = vpop.permute.xlu0 %736  ;;  %v955_v28 = vpop.permute.xlu1 %954 }
0x15e6   :  { %740 = vst.msk [vmem:[#allocation8 + $0x4] sm:$0x3] %vm303_vm3, %v737_v27  ;;  %958 = vst.msk [vmem:[#allocation8 + $0x6] sm:$0x3] %vm303_vm3, %v955_v28 }
0x15e9   :  { %v1171_v29 = vpop.permute.xlu0 %1170  ;;  %v1387_v32 = vpop.permute.xlu1 %1386 }
0x15ea   :  { %1174 = vst.msk [vmem:[#allocation8 + $0x8] sm:$0x3] %vm303_vm3, %v1171_v29  ;;  %1390 = vst.msk [vmem:[#allocation8 + $0xa] sm:$0x3] %vm303_vm3, %v1387_v32 }
0x15ed   :  { %v1603_v33 = vpop.permute.xlu0 %1602 }
0x15ee   :  { %1606 = vst.msk [vmem:[#allocation8 + $0xc] sm:$0x3] %vm303_vm3, %v1603_v33 }
0x1642   :  { %v1825_v34 = vpop.permute.xlu1 %1824 }
0x1643   :  { %1827 = vst.msk [vmem:[#allocation9] sm:$0x3] %vm303_vm3, %v1825_v34  ;;  %1829 = vst.msk [vmem:[#allocation12] sm:$0x3] %vm303_vm3, %v1825_v34 }
0x1644   :  { %2785 = shalt.err (!%p2782_p0)
}
0x1645   :  { %s2786_s13 = scalar_lea.hbm %s3481_s6, 256 }
0x1646   :  { %p2787_p1 = scmp.ne.s32.totalorder %s3481_s6, %s2786_s13  ;;  %p2790_p2 = scmp.lt.u32.totalorder %s2786_s13, %s3481_s6 }
0x1648   :  { %p2792_p3 = pnand %p2790_p2, %p2787_p1 }
0x164a   :  { %2795 = shalt.err (!%p2792_p3)
}
0x164b   :  { %1853 = dma.vmem_to_hbm [thread:$0]  %s1848_s4, 256, %s3481_s6, [#allocation10], %s2876_s1, %s2876_s1, %s2877_s28  }
0x164c   :  { %s2796_s0 = scalar_lea.vmem %s3403_s26, 32  ;;  %p2801_p5 = scmp.lt.s32.totalorder %s3403_s26, %s3403_s26 }
0x164d   :  { %p2797_p4 = scmp.ne.s32.totalorder %s3403_s26, %s2796_s0  ;;  %p2802_p6 = scmp.lt.s32.totalorder %s2796_s0, %s2796_s0 }
0x164f   :  { %p2803_p7 = por %p2802_p6, %p2801_p5 }
0x1651   :  { %p2804_p8 = pnand %p2803_p7, %p2797_p4 }
0x1653   :  { %2807 = shalt.err (!%p2804_p8)
}
0x1654   :  { %s2808_s15 = scalar_lea.hbm %s3483_s8, 32 }
0x1655   :  { %p2809_p9 = scmp.ne.s32.totalorder %s3483_s8, %s2808_s15  ;;  %p2812_p10 = scmp.lt.u32.totalorder %s2808_s15, %s3483_s8 }
0x1657   :  { %p2814_p11 = pnand %p2812_p10, %p2809_p9 }
0x1659   :  { %2817 = shalt.err (!%p2814_p11)
}
0x165a   :  { %1873 = dma.vmem_to_hbm [thread:$0]  %s3403_s26, 32, %s3483_s8, [#allocation13]   ;;  %v1819_v36 = vpop.permute.xlu1 %1818 }
0x165b   :  { %1822 = vst.msk [vmem:[#allocation8 + $0xe] sm:$0x3] %vm303_vm3, %v1819_v36  ;;  %1828 = vst.msk [vmem:[#allocation11] sm:$0x3] %vm303_vm3, %v1819_v36  ;;  %s2818_s25 = scalar_lea.vmem %s3407_s29, 256  ;;  %p2823_p13 = scmp.lt.s32.totalorder %s3407_s29, %s3407_s29 }
0x165c   :  { %p2819_p12 = scmp.ne.s32.totalorder %s3407_s29, %s2818_s25  ;;  %p2824_p0 = scmp.lt.s32.totalorder %s2818_s25, %s2818_s25 }
0x165e   :  { %p2825_p1 = por %p2824_p0, %p2823_p13 }
0x1660   :  { %p2826_p2 = pnand %p2825_p1, %p2819_p12 }
0x1662   :  { %2829 = shalt.err (!%p2826_p2)
}
0x1663   :  { %s2830_s10 = scalar_lea.hbm %s3480_s5, 256 }
0x1664   :  { %p2831_p3 = scmp.ne.s32.totalorder %s3480_s5, %s2830_s10  ;;  %p2834_p4 = scmp.lt.u32.totalorder %s2830_s10, %s3480_s5 }
0x1666   :  { %p2836_p5 = pnand %p2834_p4, %p2831_p3 }
0x1668   :  { %2839 = shalt.err (!%p2836_p5)
}
0x1669   :  { %1841 = dma.vmem_to_hbm [thread:$0]  %s3407_s29, 256, %s3480_s5, [#allocation4], %s2876_s1, %s2876_s1, %s2877_s28  }
0x166a   :  { %s2840_s17 = scalar_lea.vmem %s1861_s9, 32  ;;  %p2845_p7 = scmp.lt.s32.totalorder %s1861_s9, %s1861_s9 }
0x166b   :  { %p2841_p6 = scmp.ne.s32.totalorder %s1861_s9, %s2840_s17  ;;  %p2846_p8 = scmp.lt.s32.totalorder %s2840_s17, %s2840_s17 }
0x166d   :  { %p2847_p9 = por %p2846_p8, %p2845_p7 }
0x166f   :  { %p2848_p10 = pnand %p2847_p9, %p2841_p6 }
0x1671   :  { %2851 = shalt.err (!%p2848_p10)
}
0x1672   :  { %s2852_s21 = scalar_lea.hbm %s3482_s7, 32 }
0x1673   :  { %p2853_p11 = scmp.ne.s32.totalorder %s3482_s7, %s2852_s21  ;;  %p2856_p12 = scmp.lt.u32.totalorder %s2852_s21, %s3482_s7 }
0x1675   :  { %p2858_p13 = pnand %p2856_p12, %p2853_p11 }
0x1677   :  { %2861 = shalt.err (!%p2858_p13)
}
0x1678   :  { %1863 = dma.vmem_to_hbm [thread:$0]  %s1861_s9, 32, %s3482_s7, [#allocation10]  }
0x1679   :  { %2866 = dma.done.wait [#allocation4], 256  }
0x167a   :  { %2867 = vsyncadd [#allocation4], 4294967040 }
0x167b   :  { %2868 = dma.done.wait [#allocation10], 288  }
0x167c   :  { %2869 = vsyncadd [#allocation10], 4294967008 }
0x167d   :  { %2870 = dma.done.wait [#allocation13], 32  }
0x167e   :  { %2871 = vsyncadd [#allocation13], 4294967264 }
0x167f   :  { %1886 = vsyncpa [#allocation3], 1 }
0x1680   :  { %1887 = vsyncpa [#allocation6], 1 }
0x1681   :  { %1888 = vsyncpa [#allocation4], 1 }
0x1682   :  { %1889 = vsyncpa [#allocation10], 1 }
0x1683   :  { %1890 = vsyncpa [#allocation13], 1 }

</bundles_post_ra>
